<compile_context>
chip_gen: v7x
topology: tpu7x:2x2x1
jax: 0.10.0
libtpu: 0.0.40
codegen_flags: <defaults>
</compile_context>

<pallas_src>
import functools
import math

import jax
import jax.numpy as jnp
from jax.experimental import pallas as pl
from jax.experimental.pallas import tpu as pltpu

EPS_T = 1e-6  # the PyTorch module explicitly uses eps=1e-6 for every LayerNorm


def _layernorm(v, g, b):
    mu = jnp.mean(v, axis=-1, keepdims=True)
    var = jnp.mean(jnp.square(v - mu), axis=-1, keepdims=True)
    return (v - mu) * jax.lax.rsqrt(var + EPS_T) * g + b


# ---------------- hardware-derived sizing ----------------
def _tpu_info():
    try:
        return pltpu.get_tpu_info()
    except Exception:
        return None


def _vmem_limit_bytes():
    """~3/4 of physical VMEM: 96 MiB on v5e/v6e (128 MiB), 48 MiB on v7x (64 MiB)."""
    info = _tpu_info()
    cap = getattr(info, "vmem_capacity_bytes", None) if info is not None else None
    if not cap:
        cap = 64 * 1024 * 1024  # conservative fallback (v7x per-core VMEM)
    return int(int(cap) * 3 // 4)


def _num_tensorcores():
    info = _tpu_info()
    if info is not None:
        for attr in ("num_cores", "core_count", "num_tensorcores"):
            n = getattr(info, attr, None)
            if n:
                try:
                    n = int(n)
                except Exception:
                    continue
                if n > 0:
                    return n
    return 1


def _divisor_at_most(b, cap):
    d = max(1, min(int(cap), b))
    while b % d:
        d -= 1
    return d


def _choose_batch_block(B, T, F, FFN, H):
    """Largest batch tile whose live VMEM set fits ~60% of the scoped budget
    (fewest weight re-fetches); on multi-TC parts prefer >=2 batch tiles so
    the 'parallel' grid axis actually splits across TensorCores."""
    budget = int(_vmem_limit_bytes() * 0.6)
    # rough per-batch-row live bytes: f32 residual/x/xn/q/k/v/ctx/y +
    # bf16 q/k/v/obuf/xn copies + FFN hidden (f32+bf16) + one head's (T,T) f32
    per_row = 4 * T * 10 * F + 2 * T * 5 * F + 6 * T * FFN + 8 * T * T
    # double-buffered bf16 weights + packed small per-layer tensors
    weights = 2 * (2 * (4 * F * F + 2 * F * FFN) + 4 * (9 * F + FFN))
    fit = (budget - weights) // per_row if budget > weights else 1
    bb = _divisor_at_most(B, max(1, fit))
    ncores = _num_tensorcores()
    if ncores > 1 and B >= ncores:
        cand = _divisor_at_most(B, max(1, B // ncores))
        if (B // cand) % ncores == 0:
            bb = min(bb, cand)
    return bb


# ---------------- kernel ----------------
def transformer_block_kernel(
    x_ref, pe_ref,
    wqkv_ref, wo_ref, w1_ref, w2_ref,
    smallf_ref, b1_ref, gfbf_ref,
    out_ref,
    obuf_ref,                     # VMEM scratch: (Bb, T, F) bf16 head-output assembly
    *, n_heads,
):
    layer = pl.program_id(1)
    n_layers = pl.num_programs(1)

    # The residual stream is carried in out_ref across the serial ('arbitrary',
    # innermost) layer axis: its block index depends only on the batch index,
    # so the block stays VMEM-resident and is written back to HBM exactly once
    # per batch tile.  Layer 0 MUST initialize it before any read; do not
    # reorder the grid axes or mark the layer axis 'parallel'.
    @pl.when(layer == 0)
    def _():
        out_ref[...] = x_ref[...] + pe_ref[...][None, :, :]

    x = out_ref[...]                              # (Bb, T, F) f32 residual stream
    Bb, T, F = x.shape
    H = n_heads
    dh = F // H
    N = Bb * T

    sm = smallf_ref[0]                            # (9, F) packed per-layer params
    bq, bk, bv = sm[0:1], sm[1:2], sm[2:3]        # (1/sqrt(dh) already folded in bq)
    bo, b2 = sm[3:4], sm[4:5]
    g1, be1, g2, be2 = sm[5:6], sm[6:7], sm[7:8], sm[8:9]
    b1 = b1_ref[0]                                # (1, FFN)

    # ---------------- self attention (pre-norm) ----------------
    xn1 = _layernorm(x, g1, be1)                              # (Bb, T, F) f32
    xn1_bf = xn1.reshape(N, F).astype(jnp.bfloat16)

    # Full-width projections; bf16 operands, f32 accumulation.  The 1/sqrt(dh)
    # scale is folded into the q weights/bias at parameter-prep time.
    q = jnp.dot(xn1_bf, wqkv_ref[0, 0], preferred_element_type=jnp.float32) + bq
    k = jnp.dot(xn1_bf, wqkv_ref[0, 1], preferred_element_type=jnp.float32) + bk
    v = jnp.dot(xn1_bf, wqkv_ref[0, 2], preferred_element_type=jnp.float32) + bv
    # single whole-tensor bf16 pack (no per-head f32 slicing / packing)
    q = q.astype(jnp.bfloat16).reshape(Bb, T, F)
    k = k.astype(jnp.bfloat16).reshape(Bb, T, F)
    v = v.astype(jnp.bfloat16).reshape(Bb, T, F)

    # Per-head attention; each head's output is written at its static lane
    # offset into obuf so the head merge is ONE full-width (N,F)@(F,F) matmul.
    # TODO(synk): for long T, stream K/V blocks with an online softmax instead
    # of materializing the (Bb, T, T) score tile.
    for h in range(H):
        sl = slice(h * dh, (h + 1) * dh)
        s = jnp.einsum("bqd,bkd->bqk", q[..., sl], k[..., sl],
                       preferred_element_type=jnp.float32)   # (Bb, T, T) f32
        s = s - jnp.max(s, axis=-1, keepdims=True)
        p = jnp.exp(s)
        p = p * pl.reciprocal(jnp.sum(p, axis=-1, keepdims=True), approx=True)
        o = jnp.einsum("bqk,bkd->bqd", p.astype(jnp.bfloat16), v[..., sl],
                       preferred_element_type=jnp.float32)   # (Bb, T, dh) f32
        obuf_ref[:, :, sl] = o.astype(jnp.bfloat16)

    ctx = jnp.dot(obuf_ref[...].reshape(N, F), wo_ref[0],
                  preferred_element_type=jnp.float32) + bo    # (N, F) f32
    x = x + ctx.reshape(Bb, T, F)                 # residual 1 (dropout = 0.0)

    # ---------------- feed-forward (pre-norm) ----------------
    xn2 = _layernorm(x, g2, be2)
    h1 = jnp.dot(xn2.reshape(N, F).astype(jnp.bfloat16), w1_ref[0],
                 preferred_element_type=jnp.float32) + b1
    h1 = jnp.maximum(h1, 0.0)                     # ReLU
    h2 = jnp.dot(h1.astype(jnp.bfloat16), w2_ref[0],
                 preferred_element_type=jnp.float32) + b2
    y = x + h2.reshape(Bb, T, F)                  # residual 2 (dropout = 0.0)

    @pl.when(layer < n_layers - 1)
    def _():
        out_ref[...] = y                          # stays VMEM-resident

    @pl.when(layer == n_layers - 1)
    def _():
        gfbf = gfbf_ref[...]
        out_ref[...] = _layernorm(y, gfbf[0:1], gfbf[1:2])   # final LN, single HBM write


# ---------------- parameters ----------------
def make_positional_encoding(seq_len, n_filters):
    positions = jnp.arange(seq_len, dtype=jnp.float32)[:, None]          # (T,1)
    denom = jnp.exp(jnp.arange(0, n_filters, 2, dtype=jnp.float32)
                    * (-(math.log(10000.0) / n_filters)))                # (F/2,)
    angles = positions * denom                                           # (T,F/2)
    pe = jnp.stack([jnp.sin(angles), jnp.cos(angles)], axis=-1)          # interleave
    return pe.reshape(seq_len, n_filters)


def init_params(key, n_layers, n_filters, n_ffn, n_heads):
    """Raw f32 parameters (PyTorch-module style)."""
    L, F, FFN = n_layers, n_filters, n_ffn
    ks = jax.random.split(key, 8)
    s = 0.05
    return {
        "wqkv": s * jax.random.normal(ks[0], (L, 3, F, F), jnp.float32),
        "bqkv": s * jax.random.normal(ks[1], (L, 3, F), jnp.float32),
        "wo":   s * jax.random.normal(ks[2], (L, F, F), jnp.float32),
        "bo":   s * jax.random.normal(ks[3], (L, F), jnp.float32),
        "w1":   s * jax.random.normal(ks[4], (L, F, FFN), jnp.float32),
        "b1":   s * jax.random.normal(ks[5], (L, FFN), jnp.float32),
        "w2":   s * jax.random.normal(ks[6], (L, FFN, F), jnp.float32),
        "b2":   s * jax.random.normal(ks[7], (L, F), jnp.float32),
        "g1":   jnp.ones((L, F), jnp.float32),
        "be1":  jnp.zeros((L, F), jnp.float32),
        "g2":   jnp.ones((L, F), jnp.float32),
        "be2":  jnp.zeros((L, F), jnp.float32),
        "gf":   jnp.ones((F,), jnp.float32),
        "bf":   jnp.zeros((F,), jnp.float32),
    }


def prepare_params(raw, n_heads):
    """One-time parameter transform (outside the kernel, zero per-call cost):
      * fold 1/sqrt(dh) into the q projection (exact reparameterization),
      * cast large matmul weights to bf16 (halves weight HBM traffic),
      * pack all small per-layer (F,)-sized tensors into one (L, 9, F) array.
    """
    F = raw["wqkv"].shape[-1]
    dh = F // n_heads
    scale = 1.0 / math.sqrt(dh)
    wqkv = raw["wqkv"].at[:, 0].multiply(scale).astype(jnp.bfloat16)
    bqkv = raw["bqkv"].at[:, 0].multiply(scale)
    smallf = jnp.stack(
        [bqkv[:, 0], bqkv[:, 1], bqkv[:, 2], raw["bo"], raw["b2"],
         raw["g1"], raw["be1"], raw["g2"], raw["be2"]], axis=1)   # (L, 9, F) f32
    return {
        "wqkv": wqkv,                                  # (L, 3, F, F) bf16 (q pre-scaled)
        "wo":   raw["wo"].astype(jnp.bfloat16),        # (L, F, F)    bf16
        "w1":   raw["w1"].astype(jnp.bfloat16),        # (L, F, FFN)  bf16
        "w2":   raw["w2"].astype(jnp.bfloat16),        # (L, FFN, F)  bf16
        "smallf": smallf,                              # (L, 9, F)    f32
        "b1":   raw["b1"][:, None, :],                 # (L, 1, FFN)  f32
        "gfbf": jnp.stack([raw["gf"], raw["bf"]], 0),  # (2, F)       f32
    }


# ---------------- wrapper ----------------
def transformer_block(x, prep, *, n_heads, batch_block=None):
    B, T, F = x.shape
    L = prep["wqkv"].shape[0]
    FFN = prep["w1"].shape[-1]
    if batch_block is None:
        batch_block = _choose_batch_block(B, T, F, FFN, n_heads)
    Bb = max(1, min(batch_block, B))
    while B % Bb:
        Bb -= 1
    nb = B // Bb

    pe = make_positional_encoding(T, F)
    kernel = functools.partial(transformer_block_kernel, n_heads=n_heads)

    per_layer3 = lambda b, l: (l, 0, 0)
    per_layer4 = lambda b, l: (l, 0, 0, 0)
    per_batch = lambda b, l: (b, 0, 0)
    fixed2 = lambda b, l: (0, 0)

    grid_spec = pltpu.PrefetchScalarGridSpec(
        num_scalar_prefetch=0,
        grid=(nb, L),
        in_specs=[
            pl.BlockSpec((Bb, T, F), per_batch),       # x
            pl.BlockSpec((T, F), fixed2),              # positional encoding
            pl.BlockSpec((1, 3, F, F), per_layer4),    # wqkv (bf16, q pre-scaled)
            pl.BlockSpec((1, F, F), per_layer3),       # wo   (bf16)
            pl.BlockSpec((1, F, FFN), per_layer3),     # w1   (bf16)
            pl.BlockSpec((1, FFN, F), per_layer3),     # w2   (bf16)
            pl.BlockSpec((1, 9, F), per_layer3),       # packed small per-layer params
            pl.BlockSpec((1, 1, FFN), per_layer3),     # b1
            pl.BlockSpec((2, F), fixed2),              # final LN gamma/beta
        ],
        out_specs=pl.BlockSpec((Bb, T, F), per_batch),
        scratch_shapes=[pltpu.VMEM((Bb, T, F), jnp.bfloat16)],   # head-output assembly
    )

    return pl.pallas_call(
        kernel,
        out_shape=jax.ShapeDtypeStruct((B, T, F), jnp.float32),
        grid_spec=grid_spec,
        compiler_params=pltpu.CompilerParams(
            dimension_semantics=("parallel", "arbitrary"),
            vmem_limit_bytes=_vmem_limit_bytes()),
    )(x, pe, prep["wqkv"], prep["wo"], prep["w1"], prep["w2"],
      prep["smallf"], prep["b1"], prep["gfbf"])


# ---------------- pure-JAX reference (same bf16-operand / f32-accum policy) ----------------
def reference(x, prep, *, n_heads):
    B, T, F = x.shape
    L = prep["wqkv"].shape[0]
    H = n_heads
    dh = F // H
    bf = jnp.bfloat16
    pe = make_positional_encoding(T, F)
    h = x + pe[None]
    for l in range(L):
        sm = prep["smallf"][l]
        bq, bk, bv, bo, b2 = sm[0], sm[1], sm[2], sm[3], sm[4]
        g1, be1, g2, be2 = sm[5], sm[6], sm[7], sm[8]
        xn = _layernorm(h, g1, be1).reshape(B * T, F).astype(bf)
        q = jnp.dot(xn, prep["wqkv"][l, 0], preferred_element_type=jnp.float32) + bq
        k = jnp.dot(xn, prep["wqkv"][l, 1], preferred_element_type=jnp.float32) + bk
        v = jnp.dot(xn, prep["wqkv"][l, 2], preferred_element_type=jnp.float32) + bv
        q = q.astype(bf).reshape(B, T, H, dh)
        k = k.astype(bf).reshape(B, T, H, dh)
        v = v.astype(bf).reshape(B, T, H, dh)
        s = jnp.einsum("bqhd,bkhd->bhqk", q, k, preferred_element_type=jnp.float32)
        p = jax.nn.softmax(s, axis=-1)
        o = jnp.einsum("bhqk,bkhd->bqhd", p.astype(bf), v,
                       preferred_element_type=jnp.float32)
        o = o.reshape(B * T, F).astype(bf)
        attn = jnp.dot(o, prep["wo"][l], preferred_element_type=jnp.float32) + bo
        h = h + attn.reshape(B, T, F)
        xn2 = _layernorm(h, g2, be2).reshape(B * T, F).astype(bf)
        f1 = jnp.dot(xn2, prep["w1"][l],
                     preferred_element_type=jnp.float32) + prep["b1"][l, 0]
        f1 = jnp.maximum(f1, 0.0)
        f2 = jnp.dot(f1.astype(bf), prep["w2"][l], preferred_element_type=jnp.float32) + b2
        h = h + f2.reshape(B, T, F)
    return _layernorm(h, prep["gfbf"][0], prep["gfbf"][1])


if __name__ == "__main__":
    # Small but lane-dense shapes: F and FFN are multiples of 128 (per the
    # perf review), (batch, time, n_filters) layout as in the module.
    B, T, F = 2, 16, 128
    N_HEADS, N_FFN, N_LAYERS = 4, 256, 2

    key = jax.random.PRNGKey(0)
    kx, kp = jax.random.split(key)
    x = jax.random.normal(kx, (B, T, F), jnp.float32)
    raw = init_params(kp, N_LAYERS, F, N_FFN, N_HEADS)
    prep = prepare_params(raw, N_HEADS)

    out = transformer_block(x, prep, n_heads=N_HEADS)
    out = jax.block_until_ready(out)

    ref = reference(x, prep, n_heads=N_HEADS)
    assert out.shape == (B, T, F)
    max_err = float(jnp.max(jnp.abs(out - ref)))
    # only deltas vs reference: MXU accumulation order + approx EUP reciprocal
    assert jnp.allclose(out, ref, atol=1e-2, rtol=1e-2), max_err

    print("KERNEL_OK")
</pallas_src>

<mosaic_0001>
module attributes {stable_mosaic.version = 11 : i64} {
  func.func @transformer_block_kernel(%arg0: i32, %arg1: i32, %arg2: memref<2x16x128xf32, #tpu.memory_space<vmem>>, %arg3: memref<16x128xf32, #tpu.memory_space<vmem>>, %arg4: memref<1x3x128x128xbf16, #tpu.memory_space<vmem>>, %arg5: memref<1x128x128xbf16, #tpu.memory_space<vmem>>, %arg6: memref<1x128x256xbf16, #tpu.memory_space<vmem>>, %arg7: memref<1x256x128xbf16, #tpu.memory_space<vmem>>, %arg8: memref<1x9x128xf32, #tpu.memory_space<vmem>>, %arg9: memref<1x1x256xf32, #tpu.memory_space<vmem>>, %arg10: memref<2x128xf32, #tpu.memory_space<vmem>>, %arg11: memref<2x16x128xf32, #tpu.memory_space<vmem>>, %arg12: memref<2x16x128xbf16, #tpu.memory_space<vmem>>) attributes {dimension_semantics = [#tpu.dimension_semantics<parallel>, #tpu.dimension_semantics<arbitrary>], iteration_bounds = array<i64: 1, 2>, scalar_prefetch = 0 : i64, scratch_operands = 1 : i64, tpu.core_type = #tpu.core_type<tc>, window_params = [{transform_indices = @transform_0, window_bounds = array<i64: 2, 16, 128>}, {pipeline_mode = #tpu.pipeline_mode<synchronous>, transform_indices = @transform_1, window_bounds = array<i64: 16, 128>}, {transform_indices = @transform_2, window_bounds = array<i64: 1, 3, 128, 128>}, {transform_indices = @transform_3, window_bounds = array<i64: 1, 128, 128>}, {transform_indices = @transform_4, window_bounds = array<i64: 1, 128, 256>}, {transform_indices = @transform_5, window_bounds = array<i64: 1, 256, 128>}, {transform_indices = @transform_6, window_bounds = array<i64: 1, 9, 128>}, {transform_indices = @transform_7, window_bounds = array<i64: 1, 1, 256>}, {pipeline_mode = #tpu.pipeline_mode<synchronous>, transform_indices = @transform_8, window_bounds = array<i64: 2, 128>}, {transform_indices = @transform_9, window_bounds = array<i64: 2, 16, 128>}]} {
    %c0_i32 = arith.constant 0 : i32
    %0 = arith.cmpi eq, %arg1, %c0_i32 : i32
    %1 = arith.extui %0 : i1 to i32
    %c0_i32_0 = arith.constant 0 : i32
    %2 = arith.cmpi ne, %1, %c0_i32_0 : i32
    scf.if %2 {
      %c0_75 = arith.constant 0 : index
      %c0_76 = arith.constant 0 : index
      %c0_77 = arith.constant 0 : index
      %192 = vector.load %arg2[%c0_75, %c0_76, %c0_77] : memref<2x16x128xf32, #tpu.memory_space<vmem>>, vector<2x16x128xf32>
      %c0_78 = arith.constant 0 : index
      %c0_79 = arith.constant 0 : index
      %193 = vector.load %arg3[%c0_78, %c0_79] : memref<16x128xf32, #tpu.memory_space<vmem>>, vector<16x128xf32>
      %194 = vector.shape_cast %193 : vector<16x128xf32> to vector<1x16x128xf32>
      %195 = vector.broadcast %194 : vector<1x16x128xf32> to vector<2x16x128xf32>
      %196 = arith.addf %192, %195 : vector<2x16x128xf32>
      %c0_80 = arith.constant 0 : index
      %c0_81 = arith.constant 0 : index
      %c0_82 = arith.constant 0 : index
      %197 = vector.load %arg11[%c0_80, %c0_81, %c0_82] : memref<2x16x128xf32, #tpu.memory_space<vmem>>, vector<2x16x128xf32>
      tpu.vector_store %arg11[%c0_80, %c0_81, %c0_82], %196 {strides = array<i32>} : memref<2x16x128xf32, #tpu.memory_space<vmem>>, vector<2x16x128xf32>,
    } else {
    }
    %c0 = arith.constant 0 : index
    %c0_1 = arith.constant 0 : index
    %c0_2 = arith.constant 0 : index
    %3 = vector.load %arg11[%c0, %c0_1, %c0_2] : memref<2x16x128xf32, #tpu.memory_space<vmem>>, vector<2x16x128xf32>
    %c0_3 = arith.constant 0 : index
    %c0_4 = arith.constant 0 : index
    %c0_5 = arith.constant 0 : index
    %4 = vector.load %arg8[%c0_3, %c0_4, %c0_5] : memref<1x9x128xf32, #tpu.memory_space<vmem>>, vector<1x9x128xf32>
    %5 = vector.shape_cast %4 : vector<1x9x128xf32> to vector<9x128xf32>
    %6 = vector.extract_strided_slice %5 {offsets = [0, 0], sizes = [1, 128], strides = [1, 1]} : vector<9x128xf32> to vector<1x128xf32>
    %7 = vector.extract_strided_slice %5 {offsets = [1, 0], sizes = [1, 128], strides = [1, 1]} : vector<9x128xf32> to vector<1x128xf32>
    %8 = vector.extract_strided_slice %5 {offsets = [2, 0], sizes = [1, 128], strides = [1, 1]} : vector<9x128xf32> to vector<1x128xf32>
    %9 = vector.extract_strided_slice %5 {offsets = [3, 0], sizes = [1, 128], strides = [1, 1]} : vector<9x128xf32> to vector<1x128xf32>
    %10 = vector.extract_strided_slice %5 {offsets = [4, 0], sizes = [1, 128], strides = [1, 1]} : vector<9x128xf32> to vector<1x128xf32>
    %11 = vector.extract_strided_slice %5 {offsets = [5, 0], sizes = [1, 128], strides = [1, 1]} : vector<9x128xf32> to vector<1x128xf32>
    %12 = vector.extract_strided_slice %5 {offsets = [6, 0], sizes = [1, 128], strides = [1, 1]} : vector<9x128xf32> to vector<1x128xf32>
    %13 = vector.extract_strided_slice %5 {offsets = [7, 0], sizes = [1, 128], strides = [1, 1]} : vector<9x128xf32> to vector<1x128xf32>
    %14 = vector.extract_strided_slice %5 {offsets = [8, 0], sizes = [1, 128], strides = [1, 1]} : vector<9x128xf32> to vector<1x128xf32>
    %c0_6 = arith.constant 0 : index
    %c0_7 = arith.constant 0 : index
    %c0_8 = arith.constant 0 : index
    %15 = vector.load %arg9[%c0_6, %c0_7, %c0_8] : memref<1x1x256xf32, #tpu.memory_space<vmem>>, vector<1x1x256xf32>
    %16 = vector.shape_cast %15 : vector<1x1x256xf32> to vector<1x256xf32>
    %cst = arith.constant dense<0.000000e+00> : vector<2x16xf32>
    %17 = vector.multi_reduction <add>, %3, %cst [2] : vector<2x16x128xf32> to vector<2x16xf32>
    %18 = vector.shape_cast %17 : vector<2x16xf32> to vector<2x16x1xf32>
    %cst_9 = arith.constant 1.280000e+02 : f32
    %19 = vector.broadcast %cst_9 : f32 to vector<2x16x1xf32>
    %20 = arith.divf %18, %19 : vector<2x16x1xf32>
    %21 = vector.broadcast %20 : vector<2x16x1xf32> to vector<2x16x128xf32>
    %22 = arith.subf %3, %21 : vector<2x16x128xf32>
    %23 = arith.mulf %22, %22 : vector<2x16x128xf32>
    %cst_10 = arith.constant dense<0.000000e+00> : vector<2x16xf32>
    %24 = vector.multi_reduction <add>, %23, %cst_10 [2] : vector<2x16x128xf32> to vector<2x16xf32>
    %25 = vector.shape_cast %24 : vector<2x16xf32> to vector<2x16x1xf32>
    %cst_11 = arith.constant 1.280000e+02 : f32
    %26 = vector.broadcast %cst_11 : f32 to vector<2x16x1xf32>
    %27 = arith.divf %25, %26 : vector<2x16x1xf32>
    %28 = vector.broadcast %20 : vector<2x16x1xf32> to vector<2x16x128xf32>
    %29 = arith.subf %3, %28 : vector<2x16x128xf32>
    %cst_12 = arith.constant 9.99999997E-7 : f32
    %30 = vector.broadcast %cst_12 : f32 to vector<2x16x1xf32>
    %31 = arith.addf %27, %30 : vector<2x16x1xf32>
    %32 = math.rsqrt %31 : vector<2x16x1xf32>
    %33 = vector.broadcast %32 : vector<2x16x1xf32> to vector<2x16x128xf32>
    %34 = arith.mulf %29, %33 : vector<2x16x128xf32>
    %35 = vector.shape_cast %11 : vector<1x128xf32> to vector<1x1x128xf32>
    %36 = vector.broadcast %35 : vector<1x1x128xf32> to vector<2x16x128xf32>
    %37 = arith.mulf %34, %36 : vector<2x16x128xf32>
    %38 = vector.shape_cast %12 : vector<1x128xf32> to vector<1x1x128xf32>
    %39 = vector.broadcast %38 : vector<1x1x128xf32> to vector<2x16x128xf32>
    %40 = arith.addf %37, %39 : vector<2x16x128xf32>
    %41 = vector.shape_cast %40 : vector<2x16x128xf32> to vector<32x128xf32>
    %42 = arith.truncf %41 : vector<32x128xf32> to vector<32x128xbf16>
    %c0_13 = arith.constant 0 : index
    %c0_14 = arith.constant 0 : index
    %c0_15 = arith.constant 0 : index
    %c0_16 = arith.constant 0 : index
    %43 = vector.load %arg4[%c0_13, %c0_14, %c0_15, %c0_16] : memref<1x3x128x128xbf16, #tpu.memory_space<vmem>>, vector<1x1x128x128xbf16>
    %44 = vector.shape_cast %43 : vector<1x1x128x128xbf16> to vector<128x128xbf16>
    %cst_17 = arith.constant dense<0.000000e+00> : vector<32x128xf32>
    %45 = tpu.matmul %42, %44, %cst_17 {dimension_numbers = #tpu.dot_dimension_numbers<[1], [0], [0], [1], [0, 0, 1, 1], [], []>} : vector<32x128xbf16>, vector<128x128xbf16>, vector<32x128xf32> -> vector<32x128xf32>
    %46 = vector.broadcast %6 : vector<1x128xf32> to vector<32x128xf32>
    %47 = arith.addf %45, %46 : vector<32x128xf32>
    %c0_18 = arith.constant 0 : index
    %c1 = arith.constant 1 : index
    %c0_19 = arith.constant 0 : index
    %c0_20 = arith.constant 0 : index
    %48 = vector.load %arg4[%c0_18, %c1, %c0_19, %c0_20] : memref<1x3x128x128xbf16, #tpu.memory_space<vmem>>, vector<1x1x128x128xbf16>
    %49 = vector.shape_cast %48 : vector<1x1x128x128xbf16> to vector<128x128xbf16>
    %cst_21 = arith.constant dense<0.000000e+00> : vector<32x128xf32>
    %50 = tpu.matmul %42, %49, %cst_21 {dimension_numbers = #tpu.dot_dimension_numbers<[1], [0], [0], [1], [0, 0, 1, 1], [], []>} : vector<32x128xbf16>, vector<128x128xbf16>, vector<32x128xf32> -> vector<32x128xf32>
    %51 = vector.broadcast %7 : vector<1x128xf32> to vector<32x128xf32>
    %52 = arith.addf %50, %51 : vector<32x128xf32>
    %c0_22 = arith.constant 0 : index
    %c2 = arith.constant 2 : index
    %c0_23 = arith.constant 0 : index
    %c0_24 = arith.constant 0 : index
    %53 = vector.load %arg4[%c0_22, %c2, %c0_23, %c0_24] : memref<1x3x128x128xbf16, #tpu.memory_space<vmem>>, vector<1x1x128x128xbf16>
    %54 = vector.shape_cast %53 : vector<1x1x128x128xbf16> to vector<128x128xbf16>
    %cst_25 = arith.constant dense<0.000000e+00> : vector<32x128xf32>
    %55 = tpu.matmul %42, %54, %cst_25 {dimension_numbers = #tpu.dot_dimension_numbers<[1], [0], [0], [1], [0, 0, 1, 1], [], []>} : vector<32x128xbf16>, vector<128x128xbf16>, vector<32x128xf32> -> vector<32x128xf32>
    %56 = vector.broadcast %8 : vector<1x128xf32> to vector<32x128xf32>
    %57 = arith.addf %55, %56 : vector<32x128xf32>
    %58 = arith.truncf %47 : vector<32x128xf32> to vector<32x128xbf16>
    %59 = vector.shape_cast %58 : vector<32x128xbf16> to vector<2x16x128xbf16>
    %60 = arith.truncf %52 : vector<32x128xf32> to vector<32x128xbf16>
    %61 = vector.shape_cast %60 : vector<32x128xbf16> to vector<2x16x128xbf16>
    %62 = arith.truncf %57 : vector<32x128xf32> to vector<32x128xbf16>
    %63 = vector.shape_cast %62 : vector<32x128xbf16> to vector<2x16x128xbf16>
    %64 = vector.extract_strided_slice %59 {offsets = [0, 0, 0], sizes = [2, 16, 32], strides = [1, 1, 1]} : vector<2x16x128xbf16> to vector<2x16x32xbf16>
    %65 = vector.extract_strided_slice %61 {offsets = [0, 0, 0], sizes = [2, 16, 32], strides = [1, 1, 1]} : vector<2x16x128xbf16> to vector<2x16x32xbf16>
    "tpu.trace_start"() <{level = 10 : i32, message = "bqd,bkd->bqk"}> : () -> ()
    %cst_26 = arith.constant dense<0.000000e+00> : vector<2x16x16xf32>
    %66 = tpu.matmul %64, %65, %cst_26 {dimension_numbers = #tpu.dot_dimension_numbers<[2], [2], [1], [1], [0, 0, 0, 1, 1, 1], [0], [0]>} : vector<2x16x32xbf16>, vector<2x16x32xbf16>, vector<2x16x16xf32> -> vector<2x16x16xf32>
    "tpu.trace_stop"() : () -> ()
    %cst_27 = arith.constant dense<0xFF800000> : vector<2x16xf32>
    %67 = vector.multi_reduction <maximumf>, %66, %cst_27 [2] : vector<2x16x16xf32> to vector<2x16xf32>
    %68 = vector.shape_cast %67 : vector<2x16xf32> to vector<2x16x1xf32>
    %69 = vector.broadcast %68 : vector<2x16x1xf32> to vector<2x16x16xf32>
    %70 = arith.subf %66, %69 : vector<2x16x16xf32>
    %71 = math.exp %70 : vector<2x16x16xf32>
    %cst_28 = arith.constant dense<0.000000e+00> : vector<2x16xf32>
    %72 = vector.multi_reduction <add>, %71, %cst_28 [2] : vector<2x16x16xf32> to vector<2x16xf32>
    %73 = vector.shape_cast %72 : vector<2x16xf32> to vector<2x16x1xf32>
    %74 = tpu.reciprocal %73 {approx = true} : vector<2x16x1xf32> -> vector<2x16x1xf32>
    %75 = vector.broadcast %74 : vector<2x16x1xf32> to vector<2x16x16xf32>
    %76 = arith.mulf %71, %75 : vector<2x16x16xf32>
    %77 = arith.truncf %76 : vector<2x16x16xf32> to vector<2x16x16xbf16>
    %78 = vector.extract_strided_slice %63 {offsets = [0, 0, 0], sizes = [2, 16, 32], strides = [1, 1, 1]} : vector<2x16x128xbf16> to vector<2x16x32xbf16>
    "tpu.trace_start"() <{level = 10 : i32, message = "bqk,bkd->bqd"}> : () -> ()
    %cst_29 = arith.constant dense<0.000000e+00> : vector<2x16x32xf32>
    %79 = tpu.matmul %77, %78, %cst_29 {dimension_numbers = #tpu.dot_dimension_numbers<[2], [1], [1], [2], [0, 0, 0, 1, 1, 2], [0], [0]>} : vector<2x16x16xbf16>, vector<2x16x32xbf16>, vector<2x16x32xf32> -> vector<2x16x32xf32>
    "tpu.trace_stop"() : () -> ()
    %80 = arith.truncf %79 : vector<2x16x32xf32> to vector<2x16x32xbf16>
    %c0_30 = arith.constant 0 : index
    %c0_31 = arith.constant 0 : index
    %c0_32 = arith.constant 0 : index
    %81 = vector.load %arg12[%c0_30, %c0_31, %c0_32] : memref<2x16x128xbf16, #tpu.memory_space<vmem>>, vector<2x16x32xbf16>
    tpu.vector_store %arg12[%c0_30, %c0_31, %c0_32], %80 {strides = array<i32>} : memref<2x16x128xbf16, #tpu.memory_space<vmem>>, vector<2x16x32xbf16>,
    %82 = vector.extract_strided_slice %59 {offsets = [0, 0, 32], sizes = [2, 16, 32], strides = [1, 1, 1]} : vector<2x16x128xbf16> to vector<2x16x32xbf16>
    %83 = vector.extract_strided_slice %61 {offsets = [0, 0, 32], sizes = [2, 16, 32], strides = [1, 1, 1]} : vector<2x16x128xbf16> to vector<2x16x32xbf16>
    "tpu.trace_start"() <{level = 10 : i32, message = "bqd,bkd->bqk"}> : () -> ()
    %cst_33 = arith.constant dense<0.000000e+00> : vector<2x16x16xf32>
    %84 = tpu.matmul %82, %83, %cst_33 {dimension_numbers = #tpu.dot_dimension_numbers<[2], [2], [1], [1], [0, 0, 0, 1, 1, 1], [0], [0]>} : vector<2x16x32xbf16>, vector<2x16x32xbf16>, vector<2x16x16xf32> -> vector<2x16x16xf32>
    "tpu.trace_stop"() : () -> ()
    %cst_34 = arith.constant dense<0xFF800000> : vector<2x16xf32>
    %85 = vector.multi_reduction <maximumf>, %84, %cst_34 [2] : vector<2x16x16xf32> to vector<2x16xf32>
    %86 = vector.shape_cast %85 : vector<2x16xf32> to vector<2x16x1xf32>
    %87 = vector.broadcast %86 : vector<2x16x1xf32> to vector<2x16x16xf32>
    %88 = arith.subf %84, %87 : vector<2x16x16xf32>
    %89 = math.exp %88 : vector<2x16x16xf32>
    %cst_35 = arith.constant dense<0.000000e+00> : vector<2x16xf32>
    %90 = vector.multi_reduction <add>, %89, %cst_35 [2] : vector<2x16x16xf32> to vector<2x16xf32>
    %91 = vector.shape_cast %90 : vector<2x16xf32> to vector<2x16x1xf32>
    %92 = tpu.reciprocal %91 {approx = true} : vector<2x16x1xf32> -> vector<2x16x1xf32>
    %93 = vector.broadcast %92 : vector<2x16x1xf32> to vector<2x16x16xf32>
    %94 = arith.mulf %89, %93 : vector<2x16x16xf32>
    %95 = arith.truncf %94 : vector<2x16x16xf32> to vector<2x16x16xbf16>
    %96 = vector.extract_strided_slice %63 {offsets = [0, 0, 32], sizes = [2, 16, 32], strides = [1, 1, 1]} : vector<2x16x128xbf16> to vector<2x16x32xbf16>
    "tpu.trace_start"() <{level = 10 : i32, message = "bqk,bkd->bqd"}> : () -> ()
    %cst_36 = arith.constant dense<0.000000e+00> : vector<2x16x32xf32>
    %97 = tpu.matmul %95, %96, %cst_36 {dimension_numbers = #tpu.dot_dimension_numbers<[2], [1], [1], [2], [0, 0, 0, 1, 1, 2], [0], [0]>} : vector<2x16x16xbf16>, vector<2x16x32xbf16>, vector<2x16x32xf32> -> vector<2x16x32xf32>
    "tpu.trace_stop"() : () -> ()
    %98 = arith.truncf %97 : vector<2x16x32xf32> to vector<2x16x32xbf16>
    %c0_37 = arith.constant 0 : index
    %c0_38 = arith.constant 0 : index
    %c32 = arith.constant 32 : index
    %99 = vector.load %arg12[%c0_37, %c0_38, %c32] : memref<2x16x128xbf16, #tpu.memory_space<vmem>>, vector<2x16x32xbf16>
    tpu.vector_store %arg12[%c0_37, %c0_38, %c32], %98 {strides = array<i32>} : memref<2x16x128xbf16, #tpu.memory_space<vmem>>, vector<2x16x32xbf16>,
    %100 = vector.extract_strided_slice %59 {offsets = [0, 0, 64], sizes = [2, 16, 32], strides = [1, 1, 1]} : vector<2x16x128xbf16> to vector<2x16x32xbf16>
    %101 = vector.extract_strided_slice %61 {offsets = [0, 0, 64], sizes = [2, 16, 32], strides = [1, 1, 1]} : vector<2x16x128xbf16> to vector<2x16x32xbf16>
    "tpu.trace_start"() <{level = 10 : i32, message = "bqd,bkd->bqk"}> : () -> ()
    %cst_39 = arith.constant dense<0.000000e+00> : vector<2x16x16xf32>
    %102 = tpu.matmul %100, %101, %cst_39 {dimension_numbers = #tpu.dot_dimension_numbers<[2], [2], [1], [1], [0, 0, 0, 1, 1, 1], [0], [0]>} : vector<2x16x32xbf16>, vector<2x16x32xbf16>, vector<2x16x16xf32> -> vector<2x16x16xf32>
    "tpu.trace_stop"() : () -> ()
    %cst_40 = arith.constant dense<0xFF800000> : vector<2x16xf32>
    %103 = vector.multi_reduction <maximumf>, %102, %cst_40 [2] : vector<2x16x16xf32> to vector<2x16xf32>
    %104 = vector.shape_cast %103 : vector<2x16xf32> to vector<2x16x1xf32>
    %105 = vector.broadcast %104 : vector<2x16x1xf32> to vector<2x16x16xf32>
    %106 = arith.subf %102, %105 : vector<2x16x16xf32>
    %107 = math.exp %106 : vector<2x16x16xf32>
    %cst_41 = arith.constant dense<0.000000e+00> : vector<2x16xf32>
    %108 = vector.multi_reduction <add>, %107, %cst_41 [2] : vector<2x16x16xf32> to vector<2x16xf32>
    %109 = vector.shape_cast %108 : vector<2x16xf32> to vector<2x16x1xf32>
    %110 = tpu.reciprocal %109 {approx = true} : vector<2x16x1xf32> -> vector<2x16x1xf32>
    %111 = vector.broadcast %110 : vector<2x16x1xf32> to vector<2x16x16xf32>
    %112 = arith.mulf %107, %111 : vector<2x16x16xf32>
    %113 = arith.truncf %112 : vector<2x16x16xf32> to vector<2x16x16xbf16>
    %114 = vector.extract_strided_slice %63 {offsets = [0, 0, 64], sizes = [2, 16, 32], strides = [1, 1, 1]} : vector<2x16x128xbf16> to vector<2x16x32xbf16>
    "tpu.trace_start"() <{level = 10 : i32, message = "bqk,bkd->bqd"}> : () -> ()
    %cst_42 = arith.constant dense<0.000000e+00> : vector<2x16x32xf32>
    %115 = tpu.matmul %113, %114, %cst_42 {dimension_numbers = #tpu.dot_dimension_numbers<[2], [1], [1], [2], [0, 0, 0, 1, 1, 2], [0], [0]>} : vector<2x16x16xbf16>, vector<2x16x32xbf16>, vector<2x16x32xf32> -> vector<2x16x32xf32>
    "tpu.trace_stop"() : () -> ()
    %116 = arith.truncf %115 : vector<2x16x32xf32> to vector<2x16x32xbf16>
    %c0_43 = arith.constant 0 : index
    %c0_44 = arith.constant 0 : index
    %c64 = arith.constant 64 : index
    %117 = vector.load %arg12[%c0_43, %c0_44, %c64] : memref<2x16x128xbf16, #tpu.memory_space<vmem>>, vector<2x16x32xbf16>
    tpu.vector_store %arg12[%c0_43, %c0_44, %c64], %116 {strides = array<i32>} : memref<2x16x128xbf16, #tpu.memory_space<vmem>>, vector<2x16x32xbf16>,
    %118 = vector.extract_strided_slice %59 {offsets = [0, 0, 96], sizes = [2, 16, 32], strides = [1, 1, 1]} : vector<2x16x128xbf16> to vector<2x16x32xbf16>
    %119 = vector.extract_strided_slice %61 {offsets = [0, 0, 96], sizes = [2, 16, 32], strides = [1, 1, 1]} : vector<2x16x128xbf16> to vector<2x16x32xbf16>
    "tpu.trace_start"() <{level = 10 : i32, message = "bqd,bkd->bqk"}> : () -> ()
    %cst_45 = arith.constant dense<0.000000e+00> : vector<2x16x16xf32>
    %120 = tpu.matmul %118, %119, %cst_45 {dimension_numbers = #tpu.dot_dimension_numbers<[2], [2], [1], [1], [0, 0, 0, 1, 1, 1], [0], [0]>} : vector<2x16x32xbf16>, vector<2x16x32xbf16>, vector<2x16x16xf32> -> vector<2x16x16xf32>
    "tpu.trace_stop"() : () -> ()
    %cst_46 = arith.constant dense<0xFF800000> : vector<2x16xf32>
    %121 = vector.multi_reduction <maximumf>, %120, %cst_46 [2] : vector<2x16x16xf32> to vector<2x16xf32>
    %122 = vector.shape_cast %121 : vector<2x16xf32> to vector<2x16x1xf32>
    %123 = vector.broadcast %122 : vector<2x16x1xf32> to vector<2x16x16xf32>
    %124 = arith.subf %120, %123 : vector<2x16x16xf32>
    %125 = math.exp %124 : vector<2x16x16xf32>
    %cst_47 = arith.constant dense<0.000000e+00> : vector<2x16xf32>
    %126 = vector.multi_reduction <add>, %125, %cst_47 [2] : vector<2x16x16xf32> to vector<2x16xf32>
    %127 = vector.shape_cast %126 : vector<2x16xf32> to vector<2x16x1xf32>
    %128 = tpu.reciprocal %127 {approx = true} : vector<2x16x1xf32> -> vector<2x16x1xf32>
    %129 = vector.broadcast %128 : vector<2x16x1xf32> to vector<2x16x16xf32>
    %130 = arith.mulf %125, %129 : vector<2x16x16xf32>
    %131 = arith.truncf %130 : vector<2x16x16xf32> to vector<2x16x16xbf16>
    %132 = vector.extract_strided_slice %63 {offsets = [0, 0, 96], sizes = [2, 16, 32], strides = [1, 1, 1]} : vector<2x16x128xbf16> to vector<2x16x32xbf16>
    "tpu.trace_start"() <{level = 10 : i32, message = "bqk,bkd->bqd"}> : () -> ()
    %cst_48 = arith.constant dense<0.000000e+00> : vector<2x16x32xf32>
    %133 = tpu.matmul %131, %132, %cst_48 {dimension_numbers = #tpu.dot_dimension_numbers<[2], [1], [1], [2], [0, 0, 0, 1, 1, 2], [0], [0]>} : vector<2x16x16xbf16>, vector<2x16x32xbf16>, vector<2x16x32xf32> -> vector<2x16x32xf32>
    "tpu.trace_stop"() : () -> ()
    %134 = arith.truncf %133 : vector<2x16x32xf32> to vector<2x16x32xbf16>
    %c0_49 = arith.constant 0 : index
    %c0_50 = arith.constant 0 : index
    %c96 = arith.constant 96 : index
    %135 = vector.load %arg12[%c0_49, %c0_50, %c96] : memref<2x16x128xbf16, #tpu.memory_space<vmem>>, vector<2x16x32xbf16>
    tpu.vector_store %arg12[%c0_49, %c0_50, %c96], %134 {strides = array<i32>} : memref<2x16x128xbf16, #tpu.memory_space<vmem>>, vector<2x16x32xbf16>,
    %c0_51 = arith.constant 0 : index
    %c0_52 = arith.constant 0 : index
    %c0_53 = arith.constant 0 : index
    %136 = vector.load %arg12[%c0_51, %c0_52, %c0_53] : memref<2x16x128xbf16, #tpu.memory_space<vmem>>, vector<2x16x128xbf16>
    %137 = vector.shape_cast %136 : vector<2x16x128xbf16> to vector<32x128xbf16>
    %c0_54 = arith.constant 0 : index
    %c0_55 = arith.constant 0 : index
    %c0_56 = arith.constant 0 : index
    %138 = vector.load %arg5[%c0_54, %c0_55, %c0_56] : memref<1x128x128xbf16, #tpu.memory_space<vmem>>, vector<1x128x128xbf16>
    %139 = vector.shape_cast %138 : vector<1x128x128xbf16> to vector<128x128xbf16>
    %cst_57 = arith.constant dense<0.000000e+00> : vector<32x128xf32>
    %140 = tpu.matmul %137, %139, %cst_57 {dimension_numbers = #tpu.dot_dimension_numbers<[1], [0], [0], [1], [0, 0, 1, 1], [], []>} : vector<32x128xbf16>, vector<128x128xbf16>, vector<32x128xf32> -> vector<32x128xf32>
    %141 = vector.broadcast %9 : vector<1x128xf32> to vector<32x128xf32>
    %142 = arith.addf %140, %141 : vector<32x128xf32>
    %143 = vector.shape_cast %142 : vector<32x128xf32> to vector<2x16x128xf32>
    %144 = arith.addf %3, %143 : vector<2x16x128xf32>
    %cst_58 = arith.constant dense<0.000000e+00> : vector<2x16xf32>
    %145 = vector.multi_reduction <add>, %144, %cst_58 [2] : vector<2x16x128xf32> to vector<2x16xf32>
    %146 = vector.shape_cast %145 : vector<2x16xf32> to vector<2x16x1xf32>
    %cst_59 = arith.constant 1.280000e+02 : f32
    %147 = vector.broadcast %cst_59 : f32 to vector<2x16x1xf32>
    %148 = arith.divf %146, %147 : vector<2x16x1xf32>
    %149 = vector.broadcast %148 : vector<2x16x1xf32> to vector<2x16x128xf32>
    %150 = arith.subf %144, %149 : vector<2x16x128xf32>
    %151 = arith.mulf %150, %150 : vector<2x16x128xf32>
    %cst_60 = arith.constant dense<0.000000e+00> : vector<2x16xf32>
    %152 = vector.multi_reduction <add>, %151, %cst_60 [2] : vector<2x16x128xf32> to vector<2x16xf32>
    %153 = vector.shape_cast %152 : vector<2x16xf32> to vector<2x16x1xf32>
    %cst_61 = arith.constant 1.280000e+02 : f32
    %154 = vector.broadcast %cst_61 : f32 to vector<2x16x1xf32>
    %155 = arith.divf %153, %154 : vector<2x16x1xf32>
    %156 = vector.broadcast %148 : vector<2x16x1xf32> to vector<2x16x128xf32>
    %157 = arith.subf %144, %156 : vector<2x16x128xf32>
    %cst_62 = arith.constant 9.99999997E-7 : f32
    %158 = vector.broadcast %cst_62 : f32 to vector<2x16x1xf32>
    %159 = arith.addf %155, %158 : vector<2x16x1xf32>
    %160 = math.rsqrt %159 : vector<2x16x1xf32>
    %161 = vector.broadcast %160 : vector<2x16x1xf32> to vector<2x16x128xf32>
    %162 = arith.mulf %157, %161 : vector<2x16x128xf32>
    %163 = vector.shape_cast %13 : vector<1x128xf32> to vector<1x1x128xf32>
    %164 = vector.broadcast %163 : vector<1x1x128xf32> to vector<2x16x128xf32>
    %165 = arith.mulf %162, %164 : vector<2x16x128xf32>
    %166 = vector.shape_cast %14 : vector<1x128xf32> to vector<1x1x128xf32>
    %167 = vector.broadcast %166 : vector<1x1x128xf32> to vector<2x16x128xf32>
    %168 = arith.addf %165, %167 : vector<2x16x128xf32>
    %169 = vector.shape_cast %168 : vector<2x16x128xf32> to vector<32x128xf32>
    %170 = arith.truncf %169 : vector<32x128xf32> to vector<32x128xbf16>
    %c0_63 = arith.constant 0 : index
    %c0_64 = arith.constant 0 : index
    %c0_65 = arith.constant 0 : index
    %171 = vector.load %arg6[%c0_63, %c0_64, %c0_65] : memref<1x128x256xbf16, #tpu.memory_space<vmem>>, vector<1x128x256xbf16>
    %172 = vector.shape_cast %171 : vector<1x128x256xbf16> to vector<128x256xbf16>
    %cst_66 = arith.constant dense<0.000000e+00> : vector<32x256xf32>
    %173 = tpu.matmul %170, %172, %cst_66 {dimension_numbers = #tpu.dot_dimension_numbers<[1], [0], [0], [1], [0, 0, 1, 1], [], []>} : vector<32x128xbf16>, vector<128x256xbf16>, vector<32x256xf32> -> vector<32x256xf32>
    %174 = vector.broadcast %16 : vector<1x256xf32> to vector<32x256xf32>
    %175 = arith.addf %173, %174 : vector<32x256xf32>
    %cst_67 = arith.constant 0.000000e+00 : f32
    %176 = vector.broadcast %cst_67 : f32 to vector<32x256xf32>
    %177 = arith.maximumf %175, %176 : vector<32x256xf32>
    %178 = arith.truncf %177 : vector<32x256xf32> to vector<32x256xbf16>
    %c0_68 = arith.constant 0 : index
    %c0_69 = arith.constant 0 : index
    %c0_70 = arith.constant 0 : index
    %179 = vector.load %arg7[%c0_68, %c0_69, %c0_70] : memref<1x256x128xbf16, #tpu.memory_space<vmem>>, vector<1x256x128xbf16>
    %180 = vector.shape_cast %179 : vector<1x256x128xbf16> to vector<256x128xbf16>
    %cst_71 = arith.constant dense<0.000000e+00> : vector<32x128xf32>
    %181 = tpu.matmul %178, %180, %cst_71 {dimension_numbers = #tpu.dot_dimension_numbers<[1], [0], [0], [1], [0, 0, 1, 1], [], []>} : vector<32x256xbf16>, vector<256x128xbf16>, vector<32x128xf32> -> vector<32x128xf32>
    %182 = vector.broadcast %10 : vector<1x128xf32> to vector<32x128xf32>
    %183 = arith.addf %181, %182 : vector<32x128xf32>
    %184 = vector.shape_cast %183 : vector<32x128xf32> to vector<2x16x128xf32>
    %185 = arith.addf %144, %184 : vector<2x16x128xf32>
    %c1_i32 = arith.constant 1 : i32
    %186 = arith.cmpi slt, %arg1, %c1_i32 : i32
    %187 = arith.extui %186 : i1 to i32
    %c0_i32_72 = arith.constant 0 : i32
    %188 = arith.cmpi ne, %187, %c0_i32_72 : i32
    scf.if %188 {
      %c0_75 = arith.constant 0 : index
      %c0_76 = arith.constant 0 : index
      %c0_77 = arith.constant 0 : index
      %192 = vector.load %arg11[%c0_75, %c0_76, %c0_77] : memref<2x16x128xf32, #tpu.memory_space<vmem>>, vector<2x16x128xf32>
      tpu.vector_store %arg11[%c0_75, %c0_76, %c0_77], %185 {strides = array<i32>} : memref<2x16x128xf32, #tpu.memory_space<vmem>>, vector<2x16x128xf32>,
    } else {
    }
    %c1_i32_73 = arith.constant 1 : i32
    %189 = arith.cmpi eq, %arg1, %c1_i32_73 : i32
    %190 = arith.extui %189 : i1 to i32
    %c0_i32_74 = arith.constant 0 : i32
    %191 = arith.cmpi ne, %190, %c0_i32_74 : i32
    scf.if %191 {
      %c0_75 = arith.constant 0 : index
      %c0_76 = arith.constant 0 : index
      %192 = vector.load %arg10[%c0_75, %c0_76] : memref<2x128xf32, #tpu.memory_space<vmem>>, vector<2x128xf32>
      %193 = vector.extract_strided_slice %192 {offsets = [0, 0], sizes = [1, 128], strides = [1, 1]} : vector<2x128xf32> to vector<1x128xf32>
      %194 = vector.extract_strided_slice %192 {offsets = [1, 0], sizes = [1, 128], strides = [1, 1]} : vector<2x128xf32> to vector<1x128xf32>
      %cst_77 = arith.constant dense<0.000000e+00> : vector<2x16xf32>
      %195 = vector.multi_reduction <add>, %185, %cst_77 [2] : vector<2x16x128xf32> to vector<2x16xf32>
      %196 = vector.shape_cast %195 : vector<2x16xf32> to vector<2x16x1xf32>
      %cst_78 = arith.constant 1.280000e+02 : f32
      %197 = vector.broadcast %cst_78 : f32 to vector<2x16x1xf32>
      %198 = arith.divf %196, %197 : vector<2x16x1xf32>
      %199 = vector.broadcast %198 : vector<2x16x1xf32> to vector<2x16x128xf32>
      %200 = arith.subf %185, %199 : vector<2x16x128xf32>
      %201 = arith.mulf %200, %200 : vector<2x16x128xf32>
      %cst_79 = arith.constant dense<0.000000e+00> : vector<2x16xf32>
      %202 = vector.multi_reduction <add>, %201, %cst_79 [2] : vector<2x16x128xf32> to vector<2x16xf32>
      %203 = vector.shape_cast %202 : vector<2x16xf32> to vector<2x16x1xf32>
      %cst_80 = arith.constant 1.280000e+02 : f32
      %204 = vector.broadcast %cst_80 : f32 to vector<2x16x1xf32>
      %205 = arith.divf %203, %204 : vector<2x16x1xf32>
      %206 = vector.broadcast %198 : vector<2x16x1xf32> to vector<2x16x128xf32>
      %207 = arith.subf %185, %206 : vector<2x16x128xf32>
      %cst_81 = arith.constant 9.99999997E-7 : f32
      %208 = vector.broadcast %cst_81 : f32 to vector<2x16x1xf32>
      %209 = arith.addf %205, %208 : vector<2x16x1xf32>
      %210 = math.rsqrt %209 : vector<2x16x1xf32>
      %211 = vector.broadcast %210 : vector<2x16x1xf32> to vector<2x16x128xf32>
      %212 = arith.mulf %207, %211 : vector<2x16x128xf32>
      %213 = vector.shape_cast %193 : vector<1x128xf32> to vector<1x1x128xf32>
      %214 = vector.broadcast %213 : vector<1x1x128xf32> to vector<2x16x128xf32>
      %215 = arith.mulf %212, %214 : vector<2x16x128xf32>
      %216 = vector.shape_cast %194 : vector<1x128xf32> to vector<1x1x128xf32>
      %217 = vector.broadcast %216 : vector<1x1x128xf32> to vector<2x16x128xf32>
      %218 = arith.addf %215, %217 : vector<2x16x128xf32>
      %c0_82 = arith.constant 0 : index
      %c0_83 = arith.constant 0 : index
      %c0_84 = arith.constant 0 : index
      %219 = vector.load %arg11[%c0_82, %c0_83, %c0_84] : memref<2x16x128xf32, #tpu.memory_space<vmem>>, vector<2x16x128xf32>
      tpu.vector_store %arg11[%c0_82, %c0_83, %c0_84], %218 {strides = array<i32>} : memref<2x16x128xf32, #tpu.memory_space<vmem>>, vector<2x16x128xf32>,
    } else {
    }
    return
  }
  func.func @transform_0(%arg0: i32, %arg1: i32) -> (i32, i32, i32) {
    %c0_i32 = arith.constant 0 : i32
    %c0_i32_0 = arith.constant 0 : i32
    %c0_i32_1 = arith.constant 0 : i32
    return %arg0, %c0_i32, %c0_i32_0 : i32, i32, i32
  }
  func.func @transform_1(%arg0: i32, %arg1: i32) -> (i32, i32) {
    %c0_i32 = arith.constant 0 : i32
    %c0_i32_0 = arith.constant 0 : i32
    %c0_i32_1 = arith.constant 0 : i32
    return %c0_i32, %c0_i32_0 : i32, i32
  }
  func.func @transform_2(%arg0: i32, %arg1: i32) -> (i32, i32, i32, i32) {
    %c0_i32 = arith.constant 0 : i32
    %c0_i32_0 = arith.constant 0 : i32
    %c0_i32_1 = arith.constant 0 : i32
    %c0_i32_2 = arith.constant 0 : i32
    return %arg1, %c0_i32, %c0_i32_0, %c0_i32_1 : i32, i32, i32, i32
  }
  func.func @transform_3(%arg0: i32, %arg1: i32) -> (i32, i32, i32) {
    %c0_i32 = arith.constant 0 : i32
    %c0_i32_0 = arith.constant 0 : i32
    %c0_i32_1 = arith.constant 0 : i32
    return %arg1, %c0_i32, %c0_i32_0 : i32, i32, i32
  }
  func.func @transform_4(%arg0: i32, %arg1: i32) -> (i32, i32, i32) {
    %c0_i32 = arith.constant 0 : i32
    %c0_i32_0 = arith.constant 0 : i32
    %c0_i32_1 = arith.constant 0 : i32
    return %arg1, %c0_i32, %c0_i32_0 : i32, i32, i32
  }
  func.func @transform_5(%arg0: i32, %arg1: i32) -> (i32, i32, i32) {
    %c0_i32 = arith.constant 0 : i32
    %c0_i32_0 = arith.constant 0 : i32
    %c0_i32_1 = arith.constant 0 : i32
    return %arg1, %c0_i32, %c0_i32_0 : i32, i32, i32
  }
  func.func @transform_6(%arg0: i32, %arg1: i32) -> (i32, i32, i32) {
    %c0_i32 = arith.constant 0 : i32
    %c0_i32_0 = arith.constant 0 : i32
    %c0_i32_1 = arith.constant 0 : i32
    return %arg1, %c0_i32, %c0_i32_0 : i32, i32, i32
  }
  func.func @transform_7(%arg0: i32, %arg1: i32) -> (i32, i32, i32) {
    %c0_i32 = arith.constant 0 : i32
    %c0_i32_0 = arith.constant 0 : i32
    %c0_i32_1 = arith.constant 0 : i32
    return %arg1, %c0_i32, %c0_i32_0 : i32, i32, i32
  }
  func.func @transform_8(%arg0: i32, %arg1: i32) -> (i32, i32) {
    %c0_i32 = arith.constant 0 : i32
    %c0_i32_0 = arith.constant 0 : i32
    %c0_i32_1 = arith.constant 0 : i32
    return %c0_i32, %c0_i32_0 : i32, i32
  }
  func.func @transform_9(%arg0: i32, %arg1: i32) -> (i32, i32, i32) {
    %c0_i32 = arith.constant 0 : i32
    %c0_i32_0 = arith.constant 0 : i32
    %c0_i32_1 = arith.constant 0 : i32
    return %arg0, %c0_i32, %c0_i32_0 : i32, i32, i32
  }
}

</mosaic_0001>

<bundles_post_ra>
// kernel: tpu_custom_call.1
= control target key start
LH: loop header
LB: loop body
LE: loop exit
PB: predicated region body
PF: predicated region fallthrough
CT: control target
= control target key end

     0   :  { %s4404_s0 = inlined_call_operand.vmem [shape: f32[2,16,128], index: 0, kind: input, shape index: {}]   ;;  %s4405_s1 = inlined_call_operand.vmem [shape: f32[16,128], index: 1, kind: input, shape index: {}]   ;;  %s4406_s2 = inlined_call_operand.hbm [shape: bf16[2,3,128,128], index: 2, kind: input, shape index: {}]   ;;  %s4407_s3 = inlined_call_operand.hbm [shape: bf16[2,128,128], index: 3, kind: input, shape index: {}]   ;;  %s4408_s4 = inlined_call_operand.hbm [shape: bf16[2,128,256], index: 4, kind: input, shape index: {}]   ;;  %s4409_s5 = inlined_call_operand.hbm [shape: bf16[2,256,128], index: 5, kind: input, shape index: {}]   ;;  %s4410_s6 = inlined_call_operand.vmem [shape: f32[2,9,128], index: 6, kind: input, shape index: {}]   ;;  %s4411_s7 = inlined_call_operand.vmem [shape: f32[2,1,256], index: 7, kind: input, shape index: {}]   ;;  %s4412_s8 = inlined_call_operand.vmem [shape: f32[2,128], index: 8, kind: input, shape index: {}]   ;;  %s4413_s9 = inlined_call_operand.hbm [shape: f32[2,16,128], index: 9, kind: output, shape index: {}]  }
   0x1   :  { %4423 = sst [smem:[#allocation20_spill]] %s4406_s2 }
   0x2   :  { %4424 = sst [smem:[#allocation21_spill]] %s4407_s3 }
   0x3   :  { %4425 = sst [smem:[#allocation22_spill]] %s4408_s4 }
   0x4   :  { %4426 = sst [smem:[#allocation23_spill]] %s4413_s9 }
   0x5   :  { %14 = vsyncpa [#allocation4], 0 }
   0x6   :  { %16 = vsyncpa [#allocation4 + $0x1], 0 }
   0x7   :  { %17 = vsyncpa [#allocation7], 0 }
   0x8   :  { %19 = vsyncpa [#allocation7 + $0x1], 0 }
   0x9   :  { %20 = vsyncpa [#allocation10], 0 }
   0xa   :  { %22 = vsyncpa [#allocation10 + $0x1], 0 }
   0xb   :  { %23 = vsyncpa [#allocation5], 0  ;;  %s3742_s30 = smov 0   ;;  %s3744_s10 = smov 0  }
   0xc   :  { %s3746_s11 = smov 0   ;;  %s3748_s12 = smov 0  }
   0xd   :  { %s3750_s13 = smov 0   ;;  %s3752_s14 = smov 0  }
   0xe LB: > { %4427 = sst [smem:[#allocation16_spill]] %s3661_s11  ;;  %s3771_s15 = sadd.s32 4294967295, %s3673_s14   ;;  %s3673_s14 = sphi %s3752_s14, %s29_s14   ;;  %s3669_s13 = sphi %s3750_s13, %s4453_s13   ;;  %s3665_s12 = sphi %s3748_s12, %s4452_s12   ;;  %s3661_s11 = sphi %s3746_s11, %s4448_s11   ;;  %s3657_s10 = sphi %s3744_s10, %s4451_s10   ;;  %s3653_s30 = sphi %s3742_s30, %s4450_s30  }
   0xf   : > { %4428 = sst [smem:[#allocation17_spill]] %s3673_s14  ;;  %s38_s16 = sadd.s32 1, %s3669_s13 }
  0x10   : > { %p39_p0 = scmp.ge.s32.totalorder %s38_s16, 2  ;;  %s95_s17 = sadd.s32 1, %s3661_s11 }
  0x11   : > { %p102_p1 = scmp.ne.s32.totalorder %s3661_s11, %s3657_s10  ;;  %p103_p2 = scmp.eq.s32.totalorder %s3673_s14, 0 }
  0x12   : > { %s4455_s16 = smov (%p39_p0, %s38_s16), 0  ;;  %p108_p4 = scmp.ne.s32.totalorder %s3657_s10, %s3653_s30 }
  0x13   : > { %4429 = sst [smem:[#allocation18_spill]] %s4455_s16  ;;  %p104_p3 = por %p103_p2, %p102_p1 }
  0x14   : > { %s92_s18 = ssub.s32 %s3669_s13, %s4455_s16  ;;  %p109_p5 = scmp.eq.s32.totalorder %s3771_s15, 0 }
  0x15   : > { %p93_p6 = scmp.eq.s32.totalorder %s92_s18, 0  ;;  %p3236_p8 = scmp.lt.s32.totalorder %s3673_s14, 2 }
  0x16   : > { %p3784_p7 = por %p109_p5, %p108_p4  ;;  %s3793_s21 = sand.u32 1, %s3661_s11  }
  0x17   : > { %s3790_s20 = scalar_select %p93_p6, %s3661_s11, %s95_s17  }
  0x18   : > { %s4430_s19 = scalar_select %p3784_p7, 1, 0 }
  0x19   : > { %4431 = sst [smem:[#allocation19_spill]] %s3790_s20  ;;  %p3795_p9 = pnand %p3236_p8, %p104_p3 }
  0x1a   : > { %s346_s23 = sand.u32 1, %s3673_s14   ;;  %s2792_s24 = sshll.u32 %s3793_s21, 6 }
  0x1b   : > { %s2928_s25 = sshll.u32 %s3669_s13, 10  ;;  %s4433_s3 = sld [smem:[#allocation21_spill]] }
  0x1c   : > { %s350_s29 = scalar_lea.vmem [#allocation6], %s2792_s24  ;;  %s3810_s17 = scalar_lea.sflag [#allocation7], %s346_s23 }
  0x1d   : > { %s357_s30 = sshll.u32 %s350_s29, 4  ;;  %p3816_p12 = pneg %p3795_p9  ;;  %s3807_s30 = int_to_ptr.vmem [resolvable:$true] %s357_s30 }
  0x21   : > { %s3805_s28 = scalar_lea.hbm %s4433_s3, %s2928_s25  ;;  %s3470_s24 = scalar_lea.hbm %s4433_s3, 2048 }
  0x22   : > { %s3465_s18 = scalar_lea.hbm %s3805_s28, 1024  ;;  %p3471_p1 = scmp.lt.u32.totalorder %s3805_s28, %s4433_s3 }
  0x23   : > { %p3466_p11 = scmp.ne.s32.totalorder %s3805_s28, %s3465_s18  ;;  %p3472_p2 = scmp.lt.u32.totalorder %s3470_s24, %s3465_s18 }
  0x24   : > { %p3474_p4 = scmp.lt.u32.totalorder %s3465_s18, %s3805_s28 }
  0x25   : > { %p3468_p13 = pnand %p3816_p12, %p3466_p11  ;;  %p3473_p3 = por %p3472_p2, %p3471_p1 }
  0x27   : > { %p3469_p0 = pneg %p3468_p13  ;;  %p3475_p5 = por %p3474_p4, %p3473_p3 }
  0x29   : > { %p3476_p6 = pnand %p3475_p5, %p3469_p0 }
  0x2b   : > { %3479 = shalt.err (!%p3476_p6)
}
  0x2c   : > { %s3480_s23 = scalar_lea.vmem %s3807_s30, 1024  ;;  %s3675_s25 = smov [#allocation6]  }
  0x2d   : > { %p3481_p8 = scmp.ne.s32.totalorder %s3807_s30, %s3480_s23  ;;  %s3485_s26 = sshll.u32 %s3675_s25, 4  ;;  %s3486_s26 = int_to_ptr.vmem [resolvable:$false] %s3485_s26 }
  0x2e   : > { %s3487_s27 = scalar_lea.vmem %s3486_s26, 2048  ;;  %p3488_p10 = scmp.lt.s32.totalorder %s3807_s30, %s3486_s26 }
  0x2f   : > { %p3483_p11 = pnand %p3481_p8, %p3816_p12  ;;  %p3489_p7 = scmp.lt.s32.totalorder %s3487_s27, %s3480_s23 }
  0x31   : > { %p3484_p13 = pneg %p3483_p11  ;;  %p3490_p1 = por %p3489_p7, %p3488_p10 }
  0x33   : > { %p3491_p2 = pnand %p3490_p1, %p3484_p13 }
  0x35   : > { %3494 = shalt.err (!%p3491_p2)
}
  0x36   : > { %s4417_s18 = smov 64   ;;  %s4419_s24 = smov 4  }
  0x37   : > { %3229 = dma.hbm_to_vmem [thread:$0]  (!%p3795_p9), %s3805_s28, 1024, %s3807_s30, %s3810_s17, %s4417_s18, %s4417_s18, %s4419_s24  }
  0x38   : > { %p422_p7 = scmp.lt.s32.totalorder %s3673_s14, 3  ;;  %p4435_p10 = scmp.ge.s32.totalorder %s3673_s14, 1 }
  0x39   : > { %s3208_s23 = smul.u32 192, %s3793_s21  ;;  %s4437_s2 = sld [smem:[#allocation20_spill]] }
  0x3a   : > { %p3846_p0 = pnand %p4435_p10, %p422_p7  ;;  %s3209_s25 = smul.u32 3072, %s3669_s13 }
  0x3b   : > { %s329_s11 = scalar_lea.vmem [#allocation3], %s3208_s23  ;;  %s2929_s30 = sshll.u32 %s3669_s13, 11 }
  0x3c   : > { %s4436_s29 = scalar_select %p3846_p0, 1, 0 }
  0x3d   : > { %s336_s28 = sshll.u32 %s329_s11, 4  ;;  %s326_s18 = scalar_lea.sflag [#allocation4], %s3793_s21  ;;  %s3858_s28 = int_to_ptr.vmem [resolvable:$true] %s336_s28 }
  0x3f   : > { %s3856_s20 = scalar_lea.hbm %s4437_s2, %s3209_s25  ;;  %s3500_s3 = scalar_lea.hbm %s4437_s2, 6144 }
  0x40   : > { %s3495_s24 = scalar_lea.hbm %s3856_s20, 3072  ;;  %p3501_p6 = scmp.lt.u32.totalorder %s3856_s20, %s4437_s2 }
  0x41   : > { %p3496_p3 = scmp.ne.s32.totalorder %s3856_s20, %s3495_s24  ;;  %p3502_p8 = scmp.lt.u32.totalorder %s3500_s3, %s3495_s24 }
  0x42   : > { %p3504_p13 = scmp.lt.u32.totalorder %s3495_s24, %s3856_s20 }
  0x43   : > { %p3498_p4 = pnand %p3496_p3, %p3816_p12  ;;  %p3503_p11 = por %p3502_p8, %p3501_p6 }
  0x45   : > { %p3499_p5 = pneg %p3498_p4  ;;  %p3505_p1 = por %p3504_p13, %p3503_p11 }
  0x47   : > { %p3506_p2 = pnand %p3505_p1, %p3499_p5 }
  0x49   : > { %3509 = shalt.err (!%p3506_p2)
}
  0x4a   : > { %s3510_s11 = scalar_lea.vmem %s3858_s28, 3072  ;;  %s3678_s14 = smov [#allocation3]  }
  0x4b   : > { %p3511_p7 = scmp.ne.s32.totalorder %s3858_s28, %s3510_s11  ;;  %s3515_s23 = sshll.u32 %s3678_s14, 4  ;;  %s3516_s23 = int_to_ptr.vmem [resolvable:$false] %s3515_s23 }
  0x4c   : > { %s3517_s26 = scalar_lea.vmem %s3516_s23, 6144  ;;  %p3518_p4 = scmp.lt.s32.totalorder %s3858_s28, %s3516_s23 }
  0x4d   : > { %p3513_p10 = pnand %p3511_p7, %p3816_p12  ;;  %p3519_p0 = scmp.lt.s32.totalorder %s3517_s26, %s3510_s11 }
  0x4f   : > { %p3514_p3 = pneg %p3513_p10  ;;  %p3520_p6 = por %p3519_p0, %p3518_p4 }
  0x51   : > { %p3521_p8 = pnand %p3520_p6, %p3514_p3 }
  0x53   : > { %3524 = shalt.err (!%p3521_p8)
}
  0x54   : > { %s4438_s24 = smov 4   ;;  %s4439_s3 = smov 64  }
  0x55   : > { %3226 = dma.hbm_to_vmem [thread:$0]  (!%p3795_p9), %s3856_s20, 3072, %s3858_s28, %s326_s18, %s4439_s3, %s4439_s3, %s4438_s24  }
  0x56   : > { %s4440_s4 = sld [smem:[#allocation22_spill]]  ;;  %s4441_s14 = sshll.u32 %s3793_s21, 7 }
  0x57   : > { %s371_s23 = scalar_lea.vmem [#allocation8], %s4441_s14 }
  0x58   : > { %s378_s26 = sshll.u32 %s371_s23, 4  ;;  %s3897_s26 = int_to_ptr.vmem [resolvable:$true] %s378_s26 }
  0x5c   : > { %s3893_s11 = scalar_lea.hbm %s4440_s4, %s2929_s30  ;;  %s3530_s28 = scalar_lea.hbm %s4440_s4, 4096 }
  0x5d   : > { %s3525_s2 = scalar_lea.hbm %s3893_s11, 2048  ;;  %p3531_p13 = scmp.lt.u32.totalorder %s3893_s11, %s4440_s4 }
  0x5e   : > { %p3526_p0 = scmp.ne.s32.totalorder %s3893_s11, %s3525_s2  ;;  %p3532_p1 = scmp.lt.u32.totalorder %s3530_s28, %s3525_s2 }
  0x5f   : > { %p3534_p7 = scmp.lt.u32.totalorder %s3525_s2, %s3893_s11 }
  0x60   : > { %p3528_p5 = pnand %p3526_p0, %p3816_p12  ;;  %p3533_p2 = por %p3532_p1, %p3531_p13 }
  0x62   : > { %p3529_p11 = pneg %p3528_p5  ;;  %p3535_p10 = por %p3534_p7, %p3533_p2 }
  0x64   : > { %p3536_p3 = pnand %p3535_p10, %p3529_p11 }
  0x66   : > { %3539 = shalt.err (!%p3536_p3)
}
  0x67   : > { %s3540_s14 = scalar_lea.vmem %s3897_s26, 2048  ;;  %s3679_s23 = smov [#allocation8]  }
  0x68   : > { %p3541_p4 = scmp.ne.s32.totalorder %s3897_s26, %s3540_s14  ;;  %s3545_s20 = sshll.u32 %s3679_s23, 4  ;;  %s3546_s20 = int_to_ptr.vmem [resolvable:$false] %s3545_s20 }
  0x69   : > { %s3547_s18 = scalar_lea.vmem %s3546_s20, 4096  ;;  %p3548_p0 = scmp.lt.s32.totalorder %s3897_s26, %s3546_s20 }
  0x6a   : > { %p3543_p6 = pnand %p3541_p4, %p3816_p12  ;;  %p3549_p5 = scmp.lt.s32.totalorder %s3547_s18, %s3540_s14 }
  0x6c   : > { %p3544_p8 = pneg %p3543_p6  ;;  %p3550_p13 = por %p3549_p5, %p3548_p0 }
  0x6e   : > { %p3551_p1 = pnand %p3550_p13, %p3544_p8 }
  0x70   : > { %3554 = shalt.err (!%p3551_p1)
}
  0x71   : > { %s3680_s2 = smov 128   ;;  %s3681_s28 = smov 8  }
  0x72   : > { %3232 = dma.hbm_to_vmem [thread:$0]  (!%p3795_p9), %s3893_s11, 2048, %s3897_s26, %s3810_s17, %s3680_s2, %s3680_s2, %s3681_s28  }
  0x73   : > { %s3926_s14 = scalar_lea.hbm %s4409_s5, %s2929_s30  ;;  %s4442_s23 = sshll.u32 %s3793_s21, 7 }
  0x74   : > { %s392_s20 = scalar_lea.vmem [#allocation9], %s4442_s23  ;;  %s389_s4 = scalar_lea.sflag [#allocation10], %s3793_s21 }
  0x75   : > { %s399_s18 = sshll.u32 %s392_s20, 4  ;;  %s3555_s9 = scalar_lea.hbm %s3926_s14, 2048  ;;  %s3930_s18 = int_to_ptr.vmem [resolvable:$true] %s399_s18 }
  0x76   : > { %p3556_p11 = scmp.ne.s32.totalorder %s3926_s14, %s3555_s9  ;;  %s3560_s30 = scalar_lea.hbm %s4409_s5, 4096 }
  0x77   : > { %p3561_p10 = scmp.lt.u32.totalorder %s3926_s14, %s4409_s5  ;;  %p3562_p3 = scmp.lt.u32.totalorder %s3560_s30, %s3555_s9 }
  0x78   : > { %p3558_p2 = pnand %p3556_p11, %p3816_p12  ;;  %p3564_p6 = scmp.lt.u32.totalorder %s3555_s9, %s3926_s14 }
  0x79   : > { %p3563_p4 = por %p3562_p3, %p3561_p10 }
  0x7a   : > { %p3559_p7 = pneg %p3558_p2 }
  0x7b   : > { %p3565_p8 = por %p3564_p6, %p3563_p4 }
  0x7d   : > { %p3566_p0 = pnand %p3565_p8, %p3559_p7 }
  0x7f   : > { %3569 = shalt.err (!%p3566_p0)
}
  0x80   : > { %s3570_s28 = scalar_lea.vmem %s3930_s18, 2048  ;;  %s3682_s25 = smov [#allocation9]  }
  0x81   : > { %p3571_p5 = scmp.ne.s32.totalorder %s3930_s18, %s3570_s28  ;;  %s3575_s27 = sshll.u32 %s3682_s25, 4  ;;  %s3576_s27 = int_to_ptr.vmem [resolvable:$false] %s3575_s27 }
  0x82   : > { %s3577_s23 = scalar_lea.vmem %s3576_s27, 4096  ;;  %p3578_p11 = scmp.lt.s32.totalorder %s3930_s18, %s3576_s27 }
  0x83   : > { %p3573_p13 = pnand %p3571_p5, %p3816_p12  ;;  %p3579_p2 = scmp.lt.s32.totalorder %s3577_s23, %s3570_s28 }
  0x85   : > { %p3574_p1 = pneg %p3573_p13  ;;  %p3580_p10 = por %p3579_p2, %p3578_p11 }
  0x87   : > { %p3581_p3 = pnand %p3580_p10, %p3574_p1 }
  0x89   : > { %3584 = shalt.err (!%p3581_p3)
}
  0x8a   : > { %3235 = dma.hbm_to_vmem [thread:$0]  (!%p3795_p9), %s3926_s14, 2048, %s3930_s18, %s389_s4, %s4439_s3, %s4439_s3, %s4438_s24  }
  0x8b   : > { %p4443_p12 = scmp.ne.s32.totalorder %s4436_s29, 0 }
  0x8c   : > { %s428_s9 = sand.u32 (!%p4443_p12), 1, %s3657_s10   ;;  %p4444_p7 = scmp.ne.s32.totalorder (!%p4443_p12), %s4430_s19, 0 }
  0x8d   : > { %426 = sbr.rel (%p4443_p12) target bundleno = 4607 (0x11ff), region = 56  ;;  %s429_s20 = scalar_lea.sflag (!%p4443_p12), [#allocation4], %s428_s9 }
  0x8e   : > { %s3210_s16 = smul.u32 (!%p4443_p12), 192, %s428_s9 }
  0x90   : > { %s3962_s17 = scalar_lea.vmem (!%p4443_p12), [#allocation3], %s3210_s16 }
  0x94   : > { %3636 = dma.done.wait (%p4444_p7), %s429_s20, 3072  }
  0x95   : > { %3638 = vsyncadd (%p4444_p7), %s429_s20, 4294964224  ;;  %s437_s21 = sand.u32 1, %s3771_s15   ;;  %s2802_s22 = sshll.u32 %s428_s9, 6 }
  0x96   : > { %s438_s4 = scalar_lea.sflag [#allocation7], %s437_s21  ;;  %s3969_s24 = scalar_lea.vmem [#allocation6], %s2802_s22 }
  0x97   : > { %3640 = dma.done.wait (%p4444_p7), %s438_s4, 3072  }
  0x98   : > { %3642 = vsyncadd (%p4444_p7), %s438_s4, 4294964224  ;;  %s2803_s29 = sshll.u32 %s428_s9, 7  ;;  %s456_s14 = scalar_lea.sflag [#allocation10], %s428_s9 }
  0x99   : > { %s3975_s3 = scalar_lea.vmem [#allocation8], %s2803_s29  ;;  %s3977_s18 = scalar_lea.vmem [#allocation9], %s2803_s29 }
  0x9a   : > { %3644 = dma.done.wait (%p4444_p7), %s456_s14, 2048  }
  0x9b   : > { %3646 = vsyncadd (%p4444_p7), %s456_s14, 4294965248  ;;  %p526_p9 = scmp.lt.s32.totalorder %s3665_s12, 1  ;;  %p2808_p4 = scmp.ne.s32.totalorder %s3665_s12, 0 }
  0x9c   : > { %v541_v0 = vld [vmem:[%s4404_s0] sm:$0xff] (!%p2808_p4)  ;;  %v542_v2 = vld [vmem:[%s4404_s0 + $0x8] sm:$0xff] (!%p2808_p4)  ;;  %v543_v5 = vld [vmem:[%s4404_s0 + $0x10] sm:$0xff] (!%p2808_p4) }
  0x9d   : > { %s527_s11 = scalar_select %p526_p9, %s3665_s12, 1 }
  0x9e   : > { %540 = sbr.rel (%p2808_p4) target bundleno = 165 (0xa5), region = 76  ;;  %v545_v1 = vld [vmem:[%s4405_s1] sm:$0xff] (!%p2808_p4)  ;;  %v546_v4 = vld [vmem:[%s4405_s1 + $0x8] sm:$0xff] (!%p2808_p4)  ;;  %v544_v6 = vld [vmem:[%s4404_s0 + $0x18] sm:$0xff] (!%p2808_p4) }
  0x9f   : > { %s2931_s30 = sshll.u32 %s527_s11, 4  ;;  %s2807_s26 = sshll.u32 %s527_s11, 1  ;;  %v547_v3 = vadd.f32 (!%p2808_p4), %v545_v1, %v541_v0  ;;  %v548_v7 = vadd.f32 (!%p2808_p4), %v546_v4, %v542_v2  ;;  %v549_v8 = vadd.f32 (!%p2808_p4), %v545_v1, %v543_v5  ;;  %v550_v9 = vadd.f32 (!%p2808_p4), %v546_v4, %v544_v6 }
  0xa0   : > { %s3988_s25 = scalar_lea.vmem %s4410_s6, %s2931_s30  ;;  %s3993_s9 = scalar_lea.vmem %s4411_s7, %s2807_s26 }
  0xa1   : > { %551 = vst [vmem:[#allocation11] sm:$0xff] (!%p2808_p4), %v547_v3  ;;  %552 = vst [vmem:[#allocation11 + $0x8] sm:$0xff] (!%p2808_p4), %v548_v7 }
  0xa2   : > { %553 = vst [vmem:[#allocation11 + $0x10] sm:$0xff] (!%p2808_p4), %v549_v8  ;;  %554 = vst [vmem:[#allocation11 + $0x18] sm:$0xff] (!%p2808_p4), %v550_v9 }
  0xa5 PF: > { %v3300_v14 = vld [vmem:[%s3962_s17] sm:$0xff]   ;;  %v3302_v32 = vld [vmem:[%s3962_s17 + $0x8] sm:$0xff]   ;;  %v3304_v34 = vld [vmem:[%s3962_s17 + $0x10] sm:$0xff]   ;;  %v607_v52 = vlaneseq  ;;  %vm3684_vm0 = vmmov 0   ;;  %vm984_vm1 = vcmask 261120   ;;  %vm1079_vm2 = vcmask 130048  }
  0xa6   : > { %v3301_v15 = vld [vmem:[%s3962_s17 + $0x40] sm:$0xff]   ;;  %3032 = vmatprep.subr.bf16.mxu0 %v3300_v14  ;;  %v3303_v33 = vld [vmem:[%s3962_s17 + $0x48] sm:$0xff]   ;;  %v3305_v35 = vld [vmem:[%s3962_s17 + $0x50] sm:$0xff]   ;;  %s3686_s28 = smov 64   ;;  %s3687_s27 = smov 32   ;;  %vm1476_vm3 = vcmask 523520  }
  0xa7   : > { %3052 = vmatprep.subr.bf16.mxu1 %v3301_v15  ;;  %3033 = vmatpush3.bf16.msra.mxu0 %v3300_v14  ;;  %v3306_v36 = vld [vmem:[%s3962_s17 + $0x18] sm:$0xff]   ;;  %v3308_v38 = vld [vmem:[%s3962_s17 + $0x20] sm:$0xff]   ;;  %v3310_v40 = vld [vmem:[%s3962_s17 + $0x28] sm:$0xff]   ;;  %v4047_v58 = vshrl.u32 %v607_v52, 7  ;;  %vm1731_vm4 = vcmask 785920   ;;  %vm1986_vm5 = vcmask 1048320  }
  0xa8   : > { %v555_v10 = vld [vmem:[#allocation11] sm:$0xff]  ;;  %v556_v12 = vld [vmem:[#allocation11 + $0x8] sm:$0xff]  ;;  %3053 = vmatpush3.bf16.msra.mxu1 %v3301_v15  ;;  %3034 = vmatprep.subr.bf16.mxu0 %v3302_v32  ;;  %v3307_v37 = vld [vmem:[%s3962_s17 + $0x58] sm:$0xff]   ;;  %p2922_p6 = scmp.ge.s32.totalorder %s3665_s12, 1 }
  0xa9   : > { %v557_v11 = vld [vmem:[#allocation11 + $0x10] sm:$0xff]  ;;  %562 = vadd.xlane.f32.xlu0 %v555_v10  ;;  %v558_v13 = vld [vmem:[#allocation11 + $0x18] sm:$0xff]  ;;  %3054 = vmatprep.subr.bf16.mxu1 %v3303_v33  ;;  %v3309_v39 = vld [vmem:[%s3962_s17 + $0x60] sm:$0xff]   ;;  %v609_v61 = vsub.s32 5, %v4047_v58  ;;  %v617_v2 = vsub.s32 6, %v4047_v58 }
  0xaa   : > { %566 = vadd.xlane.f32.xlu1 %v557_v11  ;;  %v3311_v41 = vld [vmem:[%s3962_s17 + $0x68] sm:$0xff]   ;;  %v3312_v42 = vld [vmem:[%s3962_s17 + $0x30] sm:$0xff]   ;;  %v3314_v44 = vld [vmem:[%s3962_s17 + $0x38] sm:$0xff]  }
  0xab   : > { %3035 = vmatpush3.bf16.msra.mxu0 %v3302_v32  ;;  %v3313_v43 = vld [vmem:[%s3962_s17 + $0x70] sm:$0xff]   ;;  %v3315_v45 = vld [vmem:[%s3962_s17 + $0x78] sm:$0xff]   ;;  %v3316_v46 = vld [vmem:[%s3962_s17 + $0x80] sm:$0xff]  }
  0xac   : > { %3055 = vmatpush3.bf16.msra.mxu1 %v3303_v33  ;;  %3036 = vmatprep.subr.bf16.mxu0 %v3304_v34  ;;  %v4051_v62 = vld [vmem:[%s3988_s25] sm:$0xff] }
  0xad   : > { %564 = vadd.xlane.f32.xlu0 %v556_v12  ;;  %3056 = vmatprep.subr.bf16.mxu1 %v3305_v35  ;;  %v610_v1 = vrot.slane %v4051_v62, %v609_v61  ;;  %v618_v7 = vrot.slane %v4051_v62, %v617_v2 }
  0xae   : > { %568 = vadd.xlane.f32.xlu1 %v558_v13 }
  0xaf   : > { %3037 = vmatpush3.bf16.msra.mxu0 %v3304_v34 }
  0xb0   : > { %3057 = vmatpush3.bf16.msra.mxu1 %v3305_v35  ;;  %3038 = vmatprep.subr.bf16.mxu0 %v3306_v36 }
  0xb1   : > { %3058 = vmatprep.subr.bf16.mxu1 %v3307_v37 }
  0xb3   : > { %3039 = vmatpush3.bf16.msra.mxu0 %v3306_v36 }
  0xb4   : > { %3059 = vmatpush3.bf16.msra.mxu1 %v3307_v37  ;;  %3040 = vmatprep.subr.bf16.mxu0 %v3308_v38 }
  0xb5   : > { %3060 = vmatprep.subr.bf16.mxu1 %v3309_v39 }
  0xb7   : > { %3041 = vmatpush3.bf16.msra.mxu0 %v3308_v38 }
  0xb8   : > { %3061 = vmatpush3.bf16.msra.mxu1 %v3309_v39  ;;  %3042 = vmatprep.subr.bf16.mxu0 %v3310_v40 }
  0xb9   : > { %3062 = vmatprep.subr.bf16.mxu1 %v3311_v41 }
  0xbb   : > { %3043 = vmatpush3.bf16.msra.mxu0 %v3310_v40 }
  0xbc   : > { %3063 = vmatpush3.bf16.msra.mxu1 %v3311_v41  ;;  %3044 = vmatprep.subr.bf16.mxu0 %v3312_v42 }
  0xbd   : > { %3064 = vmatprep.subr.bf16.mxu1 %v3313_v43 }
  0xbf   : > { %3045 = vmatpush3.bf16.msra.mxu0 %v3312_v42 }
  0xc0   : > { %3065 = vmatpush3.bf16.msra.mxu1 %v3313_v43  ;;  %3046 = vmatprep.subr.bf16.mxu0 %v3314_v44 }
  0xc1   : > { %3066 = vmatprep.subr.bf16.mxu1 %v3315_v45 }
  0xc3   : > { %3047 = vmatpush3.bf16.msra.mxu0 %v3314_v44 }
  0xc4   : > { %3067 = vmatpush3.bf16.msra.mxu1 %v3315_v45  ;;  %3072 = vmatprep.subr.bf16.mxu0 %v3316_v46 }
 0x136   : > { %v563_v16 = vpop.xlane.xlu0 %562 }
 0x137   : > { %v567_v17 = vpop.xlane.xlu1 %566  ;;  %v571_v18 = vmul.f32 0.0078125, %v563_v16 }
 0x138   : > { %v573_v19 = vmul.f32 0.0078125, %v567_v17 }
 0x139   : > { %v4016_v20 = vsub.f32 %v555_v10, %v571_v18 }
 0x13a   : > { %v4018_v21 = vsub.f32 %v557_v11, %v573_v19  ;;  %v565_v22 = vpop.xlane.xlu0 %564 }
 0x13b   : > { %v569_v23 = vpop.xlane.xlu1 %568  ;;  %v572_v24 = vmul.f32 0.0078125, %v565_v22  ;;  %v579_v25 = vmul.f32 %v4016_v20, %v4016_v20  ;;  %v3319_v22 = vld [vmem:[%s3962_s17 + $0x98] sm:$0xff]  }
 0x13c   : > { %v574_v26 = vmul.f32 0.0078125, %v569_v23  ;;  %v581_v29 = vmul.f32 %v4018_v21, %v4018_v21  ;;  %v3320_v23 = vld [vmem:[%s3962_s17 + $0xa0] sm:$0xff]  }
 0x13d   : > { %v4022_v27 = vsub.f32 %v556_v12, %v572_v24  ;;  %583 = vadd.xlane.f32.xlu0 %v579_v25  ;;  %v3321_v24 = vld [vmem:[%s3962_s17 + $0xa8] sm:$0xff]   ;;  %v3322_v25 = vld [vmem:[%s3962_s17 + $0xb0] sm:$0xff]  }
 0x13e   : > { %v4024_v28 = vsub.f32 %v558_v13, %v574_v26  ;;  %v3323_v26 = vld [vmem:[%s3962_s17 + $0xb8] sm:$0xff]  }
 0x13f   : > { %v580_v30 = vmul.f32 %v4022_v27, %v4022_v27 }
 0x140   : > { %v582_v31 = vmul.f32 %v4024_v28, %v4024_v28 }
 0x141   : > { %587 = vadd.xlane.f32.xlu0 %v581_v29  ;;  %585 = vadd.xlane.f32.xlu1 %v580_v30  ;;  %v4077_v29 = vsub.s32 1, %v4047_v58 }
 0x145   : > { %589 = vadd.xlane.f32.xlu1 %v582_v31  ;;  %v762_v31 = vrot.slane %v4051_v62, %v4077_v29 }
 0x1ca   : > { %v584_v47 = vpop.xlane.xlu0 %583 }
 0x1cb   : > { %v591_v48 = vmul.f32 0.0078125, %v584_v47 }
 0x1cd   : > { %v595_v49 = vadd.f32 1e-06, %v591_v48 }
 0x1ce   : > { %v586_v50 = vpop.xlane.xlu1 %585  ;;  %v588_v51 = vpop.xlane.xlu0 %587 }
 0x1cf   : > { %3372 = vrsqrt.f32 %v595_v49  ;;  %v592_v53 = vmul.f32 0.0078125, %v586_v50  ;;  %v593_v54 = vmul.f32 0.0078125, %v588_v51 }
 0x1d1   : > { %v596_v55 = vadd.f32 1e-06, %v592_v53  ;;  %v597_v56 = vadd.f32 1e-06, %v593_v54  ;;  %v879_v54 = vsub.s32 2, %v4047_v58 }
 0x1d2   : > { %v590_v57 = vpop.xlane.xlu1 %589 }
 0x1d3   : > { %3374 = vrsqrt.f32 %v596_v55  ;;  %v594_v59 = vmul.f32 0.0078125, %v590_v57  ;;  %v880_v55 = vrot.slane %v4051_v62, %v879_v54 }
 0x1d4   : > { %3376 = vrsqrt.f32 %v597_v56 }
 0x1d5   : > { %v598_v60 = vadd.f32 1e-06, %v594_v59 }
 0x1d7   : > { %3378 = vrsqrt.f32 %v598_v60 }
 0x1d9   : > { %v3373_v63 = vpop.eup %3372 }
 0x1da   : > { %v603_v0 = vmul.f32 %v3373_v63, %v4016_v20  ;;  %v3317_v20 = vld [vmem:[%s3962_s17 + $0x88] sm:$0xff]  }
 0x1dc   : > { %v611_v6 = vmul.f32 %v610_v1, %v603_v0 }
 0x1dd   : > { %v3375_v3 = vpop.eup %3374 }
 0x1de   : > { %v3377_v4 = vpop.eup %3376  ;;  %v604_v5 = vmul.f32 %v3375_v3, %v4022_v27  ;;  %v619_v11 = vadd.f32 %v618_v7, %v611_v6  ;;  %v3683_v27 = vmov 0.0  }
 0x1df   : > { %v605_v8 = vmul.f32 %v3377_v4, %v4018_v21  ;;  %v3318_v21 = vld [vmem:[%s3962_s17 + $0x90] sm:$0xff]   ;;  %3092 = vmatprep.subr.bf16.mxu1 %v3683_v27  ;;  %s3685_s17 = smov 96  }
 0x1e0   : > { %v612_v9 = vmul.f32 %v610_v1, %v604_v5 }
 0x1e1   : > { %v3379_v10 = vpop.eup %3378  ;;  %v613_v14 = vmul.f32 %v610_v1, %v605_v8 }
 0x1e2   : > { %v620_v12 = vadd.f32 %v618_v7, %v612_v9  ;;  %v606_v13 = vmul.f32 %v3379_v10, %v4024_v28  ;;  %v4074_v28 = vsub.s32 0, %v4047_v58 }
 0x1e3   : > { %v621_v17 = vadd.f32 %v618_v7, %v613_v14 }
 0x1e4   : > { %v623_v15 = vpack.c.bf16 %v620_v12, %v619_v11  ;;  %v614_v16 = vmul.f32 %v610_v1, %v606_v13  ;;  %v644_v30 = vrot.slane %v4051_v62, %v4074_v28 }
 0x1e6   : > { %3048 = vmatprep.mubr.bf16.mxu0 %v623_v15  ;;  %3068 = vmatprep.mubr.bf16.mxu1 %v623_v15  ;;  %v622_v18 = vadd.f32 %v618_v7, %v614_v16 }
 0x1e8   : > { %v624_v19 = vpack.c.bf16 %v622_v18, %v621_v17 }
 0x1ea   : > { %3049 = vmatmul.mubr.bf16.vlgmr.msra.gmra.mrb[0].mxu0 %v624_v19  ;;  %3069 = vmatmul.mubr.bf16.vlgmr.msra.gmra.mrb[0].mxu1 %v624_v19 }
 0x1eb   : > { %3073 = vmatpush3.bf16.msra.mxu0 %v3316_v46  ;;  %3088 = vmatprep.mubr.bf16.mxu0 %v623_v15 }
 0x1ec   : > { %3074 = vmatprep.subr.bf16.mxu0 %v3317_v20  ;;  %3094 = vmatprep.mubr.msk.bf16.mxu1 %vm3684_vm0, %v3683_v27 }
 0x1ef   : > { %3075 = vmatpush3.bf16.msra.mxu0 %v3317_v20 }
 0x1f0   : > { %3076 = vmatprep.subr.bf16.mxu0 %v3318_v21 }
 0x1f3   : > { %3077 = vmatpush3.bf16.msra.mxu0 %v3318_v21 }
 0x1f4   : > { %3078 = vmatprep.subr.bf16.mxu0 %v3319_v22 }
 0x1f7   : > { %3079 = vmatpush3.bf16.msra.mxu0 %v3319_v22 }
 0x1f8   : > { %3080 = vmatprep.subr.bf16.mxu0 %v3320_v23 }
 0x1fb   : > { %3081 = vmatpush3.bf16.msra.mxu0 %v3320_v23 }
 0x1fc   : > { %3082 = vmatprep.subr.bf16.mxu0 %v3321_v24 }
 0x1ff   : > { %3083 = vmatpush3.bf16.msra.mxu0 %v3321_v24 }
 0x200   : > { %3084 = vmatprep.subr.bf16.mxu0 %v3322_v25 }
 0x203   : > { %3085 = vmatpush3.bf16.msra.mxu0 %v3322_v25 }
 0x204   : > { %3086 = vmatprep.subr.bf16.mxu0 %v3323_v26 }
 0x207   : > { %3087 = vmatpush3.bf16.msra.mxu0 %v3323_v26 }
 0x208   : > { %3140 = vmatprep.subr.bf16.mxu0 %v3683_v27 }
 0x20a   : > { %3089 = vmatmul.mubr.bf16.vlgmr.msra.gmra.mrb[4].mxu0 %v624_v19 }
 0x20b   : > { %3142 = vmatprep.mubr.msk.bf16.mxu0 %vm3684_vm0, %v3683_v27 }
 0x2bd   : > { %v3050_v32 = vpop.f32.mrb[0].mxu0  ;;  %v3070_v33 = vpop.f32.mrb[0].mxu1 }
 0x2be   : > { %v727_v34 = vpop.f32.mrb[1].mxu0  ;;  %v845_v35 = vpop.f32.mrb[1].mxu1  ;;  %v736_v38 = vadd.f32 %v3050_v32, %v644_v30  ;;  %v854_v39 = vadd.f32 %v3070_v33, %v762_v31 }
 0x2bf   : > { %v3051_v36 = vpop.f32.mrb[2].mxu0  ;;  %v3071_v37 = vpop.f32.mrb[2].mxu1  ;;  %v728_v44 = vadd.f32 %v727_v34, %v644_v30  ;;  %v846_v45 = vadd.f32 %v845_v35, %v762_v31 }
 0x2c0   : > { %v739_v40 = vadd.f32 %v3051_v36, %v644_v30  ;;  %v857_v41 = vadd.f32 %v3071_v37, %v762_v31  ;;  %v730_v42 = vpop.f32.mrb[3].mxu0  ;;  %v848_v43 = vpop.f32.mrb[3].mxu1 }
 0x2c1   : > { %v731_v46 = vadd.f32 %v730_v42, %v644_v30  ;;  %v849_v47 = vadd.f32 %v848_v43, %v762_v31 }
 0x2c2   : > { %v4083_v48 = vpack.c.bf16 %v739_v40, %v736_v38  ;;  %v4085_v49 = vpack.c.bf16 %v857_v41, %v854_v39 }
 0x2c3   : > { %v4087_v50 = vpack.c.bf16 %v731_v46, %v728_v44  ;;  %v4089_v51 = vpack.c.bf16 %v849_v47, %v846_v45 }
 0x2c4   : > { %v1036_v53 = vsel %vm984_vm1, %v4085_v49, 0 }
 0x2c5   : > { %v989_v52 = vsel %vm984_vm1, %v4089_v51, 0 }
 0x2c6   : > { %3093 = vmatpush3.bf16.xpose.msra.mxu1 %v989_v52 }
 0x2c7   : > { %3098 = vmatprep.subr.bf16.mxu1 %v3683_v27 }
 0x2cd   : > { %3095 = vmatmul.mubr.msk.bf16.vlgmr.msra.gmra.mrb[4].mxu1 %vm984_vm1, %v4087_v50 }
 0x2ce   : > { %3099 = vmatpush3.bf16.xpose.msra.mxu1 %v1036_v53  ;;  %3100 = vmatprep.mubr.msk.bf16.mxu1 %vm3684_vm0, %v3683_v27 }
 0x2cf   : > { %3104 = vmatprep.subr.bf16.mxu1 %v3683_v27 }
 0x2d5   : > { %3101 = vmatmul.mubr.msk.bf16.vlgmr.msra.gmra.mrb[8].mxu1 %vm984_vm1, %v4083_v48 }
 0x2d6   : > { %3106 = vmatprep.mubr.msk.bf16.mxu1 %vm3684_vm0, %v3683_v27 }
 0x2dd   : > { %v3090_v56 = vpop.f32.mrb[4].mxu0 }
 0x2de   : > { %v972_v57 = vadd.f32 %v3090_v56, %v880_v55  ;;  %v963_v59 = vpop.f32.mrb[5].mxu0 }
 0x2df   : > { %v3091_v60 = vpop.f32.mrb[6].mxu0  ;;  %v964_v0 = vadd.f32 %v963_v59, %v880_v55 }
 0x2e0   : > { %v975_v61 = vadd.f32 %v3091_v60, %v880_v55  ;;  %v966_v63 = vpop.f32.mrb[7].mxu0 }
 0x2e1   : > { %v967_v1 = vadd.f32 %v966_v63, %v880_v55 }
 0x2e2   : > { %v4107_v2 = vpack.c.bf16 %v975_v61, %v972_v57 }
 0x2e3   : > { %v4109_v3 = vpack.c.bf16 %v967_v1, %v964_v0 }
 0x2e5   : > { %3105 = vmatpush3.bf16.msra.mxu1 %v4109_v3 }
 0x2e6   : > { %3110 = vmatprep.subr.bf16.mxu1 %v3683_v27 }
 0x3a0   : > { %v1025_v4 = vpop.f32.mrb[4].mxu1 }
 0x3a1   : > { %v3096_v5 = vpop.f32.mrb[5].mxu1  ;;  %v1080_v62 = vsel %vm1079_vm2, %v1025_v4, -inf }
 0x3a2   : > { %1081 = vmax.xlane.f32.xlu0 %v1080_v62  ;;  %v1028_v6 = vpop.f32.mrb[6].mxu1 }
 0x3a3   : > { %v3097_v7 = vpop.f32.mrb[7].mxu1  ;;  %v1083_v8 = vsel %vm1079_vm2, %v1028_v6, -inf }
 0x3a4   : > { %1084 = vmax.xlane.f32.xlu1 %v1083_v8 }
 0x3a8   : > { %v1072_v9 = vpop.f32.mrb[8].mxu1 }
 0x3a9   : > { %v3102_v10 = vpop.f32.mrb[9].mxu1  ;;  %v1086_v11 = vsel %vm1079_vm2, %v1072_v9, -inf }
 0x3aa   : > { %1087 = vmax.xlane.f32.xlu0 %v1086_v11  ;;  %v1075_v12 = vpop.f32.mrb[10].mxu1 }
 0x3ab   : > { %v3103_v13 = vpop.f32.mrb[11].mxu1  ;;  %v1089_v14 = vsel %vm1079_vm2, %v1075_v12, -inf }
 0x3ac   : > { %1090 = vmax.xlane.f32.xlu1 %v1089_v14 }
 0x42f   : > { %v1082_v15 = vpop.xlane.xlu0 %1081 }
 0x430   : > { %v1092_v16 = vsub.f32 %v1025_v4, %v1082_v15 }
 0x431   : > { %v1085_v17 = vpop.xlane.xlu1 %1084 }
 0x432   : > { %v1096_v18 = vmul.f32 1.442695, %v1092_v16  ;;  %v1093_v19 = vsub.f32 %v1028_v6, %v1085_v17 }
 0x434   : > { %3380 = vpow2.f32 %v1096_v18  ;;  %v1098_v20 = vmul.f32 1.442695, %v1093_v19 }
 0x436   : > { %3382 = vpow2.f32 %v1098_v20 }
 0x437   : > { %v1088_v21 = vpop.xlane.xlu0 %1087 }
 0x438   : > { %v1094_v22 = vsub.f32 %v1072_v9, %v1088_v21 }
 0x439   : > { %v1091_v23 = vpop.xlane.xlu1 %1090 }
 0x43a   : > { %v1100_v24 = vmul.f32 1.442695, %v1094_v22  ;;  %v1095_v25 = vsub.f32 %v1075_v12, %v1091_v23 }
 0x43c   : > { %3384 = vpow2.f32 %v1100_v24  ;;  %v1102_v26 = vmul.f32 1.442695, %v1095_v25 }
 0x43e   : > { %v3381_v30 = vpop.eup %3380  ;;  %3386 = vpow2.f32 %v1102_v26 }
 0x43f   : > { %v1104_v31 = vsel %vm1079_vm2, %v3381_v30, 0.0 }
 0x440   : > { %v3383_v32 = vpop.eup %3382  ;;  %1105 = vadd.xlane.f32.xlu0 %v1104_v31 }
 0x441   : > { %v1107_v33 = vsel %vm1079_vm2, %v3383_v32, 0.0 }
 0x442   : > { %1108 = vadd.xlane.f32.xlu1 %v1107_v33 }
 0x446   : > { %v3385_v34 = vpop.eup %3384 }
 0x447   : > { %v1110_v35 = vsel %vm1079_vm2, %v3385_v34, 0.0 }
 0x448   : > { %v3387_v36 = vpop.eup %3386  ;;  %1111 = vadd.xlane.f32.xlu0 %v1110_v35 }
 0x449   : > { %v1113_v37 = vsel %vm1079_vm2, %v3387_v36, 0.0 }
 0x44a   : > { %1114 = vadd.xlane.f32.xlu1 %v1113_v37 }
 0x45b   : > { %1219 = vrot.lane.b32.xlu1 %v4087_v50, %s3685_s17 }
 0x45e   : > { %1222 = vrot.lane.b32.xlu0 %v4089_v51, %s3685_s17 }
 0x45f   : > { %1275 = vrot.lane.b32.xlu1 %v4085_v49, %s3685_s17 }
 0x463   : > { %1272 = vrot.lane.b32.xlu1 %v4083_v48, %s3685_s17 }
 0x4cd   : > { %v1106_v38 = vpop.xlane.xlu0 %1105 }
 0x4ce   : > { %3388 = vrcp.f32 %v1106_v38 }
 0x4cf   : > { %v1109_v39 = vpop.xlane.xlu1 %1108 }
 0x4d0   : > { %3390 = vrcp.f32 %v1109_v39 }
 0x4d5   : > { %v1112_v40 = vpop.xlane.xlu0 %1111 }
 0x4d6   : > { %3392 = vrcp.f32 %v1112_v40 }
 0x4d7   : > { %v1115_v41 = vpop.xlane.xlu1 %1114 }
 0x4d8   : > { %v3389_v42 = vpop.eup %3388  ;;  %3394 = vrcp.f32 %v1115_v41 }
 0x4d9   : > { %v1120_v44 = vmul.f32 %v3389_v42, %v3381_v30  ;;  %v1223_v55 = vpop.permute.xlu0 %1222 }
 0x4da   : > { %v3391_v43 = vpop.eup %3390  ;;  %v1228_v59 = vsel %vm984_vm1, %v1223_v55, 0 }
 0x4db   : > { %v1121_v45 = vmul.f32 %v3391_v43, %v3383_v32  ;;  %v1220_v57 = vpop.permute.xlu1 %1219 }
 0x4dd   : > { %v1124_v46 = vpack.c.bf16 %v1121_v45, %v1120_v44 }
 0x4df   : > { %3107 = vmatmul.mubr.msk.bf16.vlgmr.msra.gmra.mrb[12].mxu1 %vm1079_vm2, %v1124_v46  ;;  %v1276_v60 = vpop.permute.xlu1 %1275 }
 0x4e0   : > { %v3393_v47 = vpop.eup %3392  ;;  %3111 = vmatpush3.bf16.msra.mxu1 %v4107_v2  ;;  %3112 = vmatprep.mubr.msk.bf16.mxu1 %vm3684_vm0, %v3683_v27  ;;  %v1281_v61 = vsel %vm984_vm1, %v1276_v60, 0 }
 0x4e1   : > { %3116 = vmatprep.subr.bf16.mxu1 %v3683_v27  ;;  %v1122_v53 = vmul.f32 %v3393_v47, %v3385_v34 }
 0x4e2   : > { %v3395_v52 = vpop.eup %3394 }
 0x4e3   : > { %v1123_v54 = vmul.f32 %v3395_v52, %v3387_v36  ;;  %v1273_v63 = vpop.permute.xlu1 %1272 }
 0x4e5   : > { %v1125_v56 = vpack.c.bf16 %v1123_v54, %v1122_v53 }
 0x4e7   : > { %3113 = vmatmul.mubr.msk.bf16.vlgmr.msra.gmra.mrb[16].mxu1 %vm1079_vm2, %v1125_v56 }
 0x4e8   : > { %3118 = vmatprep.mubr.msk.bf16.mxu1 %vm3684_vm0, %v3683_v27 }
 0x4e9   : > { %3117 = vmatpush3.bf16.xpose.msra.mxu1 %v1228_v59 }
 0x4ea   : > { %3122 = vmatprep.subr.bf16.mxu1 %v3683_v27 }
 0x4f0   : > { %3119 = vmatmul.mubr.msk.bf16.vlgmr.msra.gmra.mrb[20].mxu1 %vm984_vm1, %v1220_v57 }
 0x4f1   : > { %3123 = vmatpush3.bf16.xpose.msra.mxu1 %v1281_v61  ;;  %3124 = vmatprep.mubr.msk.bf16.mxu1 %vm3684_vm0, %v3683_v27 }
 0x4f2   : > { %3128 = vmatprep.subr.bf16.mxu1 %v3683_v27 }
 0x4f8   : > { %3125 = vmatmul.mubr.msk.bf16.vlgmr.msra.gmra.mrb[24].mxu1 %vm984_vm1, %v1273_v63 }
 0x4f9   : > { %3130 = vmatprep.mubr.msk.bf16.mxu1 %vm3684_vm0, %v3683_v27 }
 0x5b2   : > { %v1163_v0 = vpop.f32.mrb[12].mxu1 }
 0x5b3   : > { %v3108_v1 = vpop.f32.mrb[13].mxu1 }
 0x5b4   : > { %v1166_v4 = vpop.f32.mrb[14].mxu1 }
 0x5b5   : > { %v1214_v5 = vpack.c.bf16 %v1166_v4, %v1163_v0  ;;  %v3109_v62 = vpop.f32.mrb[15].mxu1 }
 0x5b7   : > { %1216 = vst.msk [vmem:[#allocation2] sm:$0xff] %vm984_vm1, %v1214_v5 }
 0x5ba   : > { %v1207_v6 = vpop.f32.mrb[16].mxu1 }
 0x5bb   : > { %v3114_v7 = vpop.f32.mrb[17].mxu1 }
 0x5bc   : > { %v1210_v8 = vpop.f32.mrb[18].mxu1 }
 0x5bd   : > { %v1215_v9 = vpack.c.bf16 %v1210_v8, %v1207_v6  ;;  %v3115_v10 = vpop.f32.mrb[19].mxu1 }
 0x5bf   : > { %1217 = vst.msk [vmem:[#allocation2 + $0x8] sm:$0xff] %vm984_vm1, %v1215_v9 }
 0x5c3   : > { %v1264_v11 = vpop.f32.mrb[20].mxu1 }
 0x5c4   : > { %v3120_v12 = vpop.f32.mrb[21].mxu1  ;;  %v1324_v13 = vsel %vm1079_vm2, %v1264_v11, -inf }
 0x5c5   : > { %1325 = vmax.xlane.f32.xlu0 %v1324_v13  ;;  %v1267_v14 = vpop.f32.mrb[22].mxu1 }
 0x5c6   : > { %v3121_v15 = vpop.f32.mrb[23].mxu1  ;;  %v1327_v16 = vsel %vm1079_vm2, %v1267_v14, -inf }
 0x5c7   : > { %1328 = vmax.xlane.f32.xlu1 %v1327_v16 }
 0x5cb   : > { %v1317_v17 = vpop.f32.mrb[24].mxu1 }
 0x5cc   : > { %v3126_v18 = vpop.f32.mrb[25].mxu1  ;;  %v1330_v19 = vsel %vm1079_vm2, %v1317_v17, -inf }
 0x5cd   : > { %1331 = vmax.xlane.f32.xlu0 %v1330_v19  ;;  %v1320_v20 = vpop.f32.mrb[26].mxu1 }
 0x5ce   : > { %v3127_v21 = vpop.f32.mrb[27].mxu1  ;;  %v1333_v22 = vsel %vm1079_vm2, %v1320_v20, -inf }
 0x5d1   : > { %1334 = vmax.xlane.f32.xlu0 %v1333_v22 }
 0x652   : > { %v1326_v23 = vpop.xlane.xlu0 %1325 }
 0x653   : > { %v1336_v24 = vsub.f32 %v1264_v11, %v1326_v23 }
 0x654   : > { %v1329_v25 = vpop.xlane.xlu1 %1328 }
 0x655   : > { %v1340_v26 = vmul.f32 1.442695, %v1336_v24  ;;  %v1337_v30 = vsub.f32 %v1267_v14, %v1329_v25 }
 0x657   : > { %3396 = vpow2.f32 %v1340_v26  ;;  %v1342_v31 = vmul.f32 1.442695, %v1337_v30 }
 0x659   : > { %3398 = vpow2.f32 %v1342_v31 }
 0x65a   : > { %v1332_v32 = vpop.xlane.xlu0 %1331 }
 0x65b   : > { %v1338_v33 = vsub.f32 %v1317_v17, %v1332_v32 }
 0x65d   : > { %v1344_v34 = vmul.f32 1.442695, %v1338_v33 }
 0x65e   : > { %v1335_v41 = vpop.xlane.xlu0 %1334 }
 0x65f   : > { %3400 = vpow2.f32 %v1344_v34  ;;  %v1339_v42 = vsub.f32 %v1320_v20, %v1335_v41 }
 0x661   : > { %v3397_v35 = vpop.eup %3396  ;;  %v1346_v43 = vmul.f32 1.442695, %v1339_v42 }
 0x662   : > { %v1348_v36 = vsel %vm1079_vm2, %v3397_v35, 0.0 }
 0x663   : > { %v3399_v37 = vpop.eup %3398  ;;  %1349 = vadd.xlane.f32.xlu0 %v1348_v36  ;;  %3402 = vpow2.f32 %v1346_v43 }
 0x664   : > { %v1351_v38 = vsel %vm1079_vm2, %v3399_v37, 0.0 }
 0x665   : > { %1352 = vadd.xlane.f32.xlu1 %v1351_v38 }
 0x669   : > { %v3401_v39 = vpop.eup %3400 }
 0x66a   : > { %v1354_v40 = vsel %vm1079_vm2, %v3401_v39, 0.0 }
 0x66b   : > { %1355 = vadd.xlane.f32.xlu0 %v1354_v40 }
 0x66d   : > { %v3403_v44 = vpop.eup %3402 }
 0x66e   : > { %v1357_v45 = vsel %vm1079_vm2, %v3403_v44, 0.0 }
 0x676   : > { %1419 = vrot.lane.b32.xlu1 %v4107_v2, %s3685_s17 }
 0x67a   : > { %1481 = vrot.lane.b32.xlu1 %v4089_v51, %s3686_s28 }
 0x681   : > { %1371 = vrot.lane.b32.xlu0 %v4109_v3, %s3685_s17 }
 0x685   : > { %1479 = vrot.lane.b32.xlu0 %v4087_v50, %s3686_s28 }
 0x69e   : > { %1358 = vadd.xlane.f32.xlu1 %v1357_v45 }
 0x6af   : > { %1532 = vrot.lane.b32.xlu1 %v4085_v49, %s3686_s28 }
 0x6b3   : > { %1530 = vrot.lane.b32.xlu1 %v4083_v48, %s3686_s28 }
 0x6f0   : > { %v1350_v46 = vpop.xlane.xlu0 %1349 }
 0x6f1   : > { %3404 = vrcp.f32 %v1350_v46 }
 0x6f2   : > { %v1353_v47 = vpop.xlane.xlu1 %1352 }
 0x6f3   : > { %3406 = vrcp.f32 %v1353_v47 }
 0x6f6   : > { %v1420_v52 = vpop.permute.xlu1 %1419 }
 0x6f8   : > { %v1356_v53 = vpop.xlane.xlu0 %1355 }
 0x6f9   : > { %3408 = vrcp.f32 %v1356_v53 }
 0x6fa   : > { %v1482_v54 = vpop.permute.xlu1 %1481 }
 0x6fb   : > { %v3405_v55 = vpop.eup %3404  ;;  %v1487_v56 = vsel %vm984_vm1, %v1482_v54, 0 }
 0x6fc   : > { %3141 = vmatpush3.bf16.xpose.msra.mxu0 %v1487_v56  ;;  %v1372_v57 = vpop.permute.xlu0 %1371  ;;  %v1364_v60 = vmul.f32 %v3405_v55, %v3397_v35 }
 0x6fd   : > { %v3407_v59 = vpop.eup %3406  ;;  %3129 = vmatpush3.bf16.msra.mxu1 %v1372_v57  ;;  %3152 = vmatprep.subr.bf16.mxu0 %v3683_v27 }
 0x6fe   : > { %v1365_v61 = vmul.f32 %v3407_v59, %v3399_v37  ;;  %3134 = vmatprep.subr.bf16.mxu1 %v3683_v27 }
 0x700   : > { %v1368_v63 = vpack.c.bf16 %v1365_v61, %v1364_v60  ;;  %v1480_v0 = vpop.permute.xlu0 %1479 }
 0x702   : > { %3131 = vmatmul.mubr.msk.bf16.vlgmr.msra.gmra.mrb[28].mxu1 %vm1079_vm2, %v1368_v63 }
 0x703   : > { %3135 = vmatpush3.bf16.msra.mxu1 %v1420_v52  ;;  %3143 = vmatmul.mubr.msk.bf16.vlgmr.msra.gmra.mrb[8].mxu0 %vm984_vm1, %v1480_v0  ;;  %v3409_v4 = vpop.eup %3408 }
 0x704   : > { %3136 = vmatprep.mubr.msk.bf16.mxu1 %vm3684_vm0, %v3683_v27  ;;  %3146 = vmatprep.subr.bf16.mxu1 %v3683_v27  ;;  %v1366_v62 = vmul.f32 %v3409_v4, %v3401_v39 }
 0x705   : > { %3154 = vmatprep.mubr.msk.bf16.mxu0 %vm3684_vm0, %v3683_v27 }
 0x72b   : > { %v1359_v1 = vpop.xlane.xlu1 %1358 }
 0x72c   : > { %3410 = vrcp.f32 %v1359_v1 }
 0x72f   : > { %v1533_v7 = vpop.permute.xlu1 %1532 }
 0x730   : > { %v1538_v9 = vsel %vm984_vm1, %v1533_v7, 0 }
 0x733   : > { %v1531_v10 = vpop.permute.xlu1 %1530 }
 0x736   : > { %v3411_v5 = vpop.eup %3410 }
 0x737   : > { %v1367_v6 = vmul.f32 %v3411_v5, %v3403_v44 }
 0x739   : > { %v1369_v8 = vpack.c.bf16 %v1367_v6, %v1366_v62 }
 0x73b   : > { %3137 = vmatmul.mubr.msk.bf16.vlgmr.msra.gmra.mrb[32].mxu1 %vm1079_vm2, %v1369_v8 }
 0x73c   : > { %3147 = vmatpush3.bf16.xpose.msra.mxu1 %v1538_v9  ;;  %3148 = vmatprep.mubr.msk.bf16.mxu1 %vm3684_vm0, %v3683_v27 }
 0x73d   : > { %3158 = vmatprep.subr.bf16.mxu1 %v3683_v27 }
 0x743   : > { %3149 = vmatmul.mubr.msk.bf16.vlgmr.msra.gmra.mrb[36].mxu1 %vm984_vm1, %v1531_v10 }
 0x744   : > { %3160 = vmatprep.mubr.msk.bf16.mxu1 %vm3684_vm0, %v3683_v27 }
 0x7d5   : > { %v4187_v11 = vpop.f32.mrb[28].mxu1 }
 0x7d6   : > { %v3132_v12 = vpop.f32.mrb[29].mxu1  ;;  %v1523_v13 = vpop.f32.mrb[8].mxu0 }
 0x7d7   : > { %v4189_v14 = vpop.f32.mrb[30].mxu1  ;;  %v3144_v15 = vpop.f32.mrb[9].mxu0  ;;  %v1581_v16 = vsel %vm1079_vm2, %v1523_v13, -inf }
 0x7d8   : > { %v1466_v17 = vpack.c.bf16 %v4189_v14, %v4187_v11  ;;  %1582 = vmax.xlane.f32.xlu0 %v1581_v16  ;;  %v3133_v18 = vpop.f32.mrb[31].mxu1  ;;  %v1526_v19 = vpop.f32.mrb[10].mxu0 }
 0x7d9   : > { %v3145_v20 = vpop.f32.mrb[11].mxu0  ;;  %v1584_v21 = vsel %vm1079_vm2, %v1526_v19, -inf }
 0x7da   : > { %1585 = vmax.xlane.f32.xlu1 %v1584_v21 }
 0x80e   : > { %v4195_v22 = vpop.f32.mrb[32].mxu1 }
 0x80f   : > { %v3138_v23 = vpop.f32.mrb[33].mxu1 }
 0x810   : > { %v4197_v24 = vpop.f32.mrb[34].mxu1 }
 0x811   : > { %v1467_v25 = vpack.c.bf16 %v4197_v24, %v4195_v22  ;;  %v3139_v26 = vpop.f32.mrb[35].mxu1 }
 0x816   : > { %v1574_v30 = vpop.f32.mrb[36].mxu1 }
 0x817   : > { %v3150_v31 = vpop.f32.mrb[37].mxu1  ;;  %v1587_v32 = vsel %vm1079_vm2, %v1574_v30, -inf }
 0x818   : > { %1588 = vmax.xlane.f32.xlu0 %v1587_v32  ;;  %v1577_v33 = vpop.f32.mrb[38].mxu1 }
 0x819   : > { %v3151_v34 = vpop.f32.mrb[39].mxu1  ;;  %v1590_v35 = vsel %vm1079_vm2, %v1577_v33, -inf }
 0x81c   : > { %1591 = vmax.xlane.f32.xlu0 %v1590_v35 }
 0x865   : > { %v1583_v36 = vpop.xlane.xlu0 %1582 }
 0x866   : > { %v1593_v37 = vsub.f32 %v1523_v13, %v1583_v36 }
 0x867   : > { %v1586_v38 = vpop.xlane.xlu1 %1585 }
 0x868   : > { %v1597_v39 = vmul.f32 1.442695, %v1593_v37  ;;  %v1594_v40 = vsub.f32 %v1526_v19, %v1586_v38 }
 0x86a   : > { %3412 = vpow2.f32 %v1597_v39  ;;  %v1599_v41 = vmul.f32 1.442695, %v1594_v40 }
 0x86c   : > { %3414 = vpow2.f32 %v1599_v41 }
 0x874   : > { %v3413_v42 = vpop.eup %3412 }
 0x875   : > { %v1605_v43 = vsel %vm1079_vm2, %v3413_v42, 0.0 }
 0x876   : > { %v3415_v44 = vpop.eup %3414  ;;  %1606 = vadd.xlane.f32.xlu0 %v1605_v43 }
 0x877   : > { %v1608_v45 = vsel %vm1079_vm2, %v3415_v44, 0.0 }
 0x878   : > { %1609 = vadd.xlane.f32.xlu1 %v1608_v45 }
 0x889   : > { %1674 = vrot.lane.b32.xlu1 %v4107_v2, %s3686_s28 }
 0x88d   : > { %1736 = vrot.lane.b32.xlu1 %v4089_v51, %s3687_s27 }
 0x8a5   : > { %v1589_v46 = vpop.xlane.xlu0 %1588 }
 0x8a6   : > { %v1595_v47 = vsub.f32 %v1574_v30, %v1589_v46 }
 0x8a8   : > { %v1601_v52 = vmul.f32 1.442695, %v1595_v47 }
 0x8a9   : > { %v1592_v53 = vpop.xlane.xlu0 %1591 }
 0x8aa   : > { %3416 = vpow2.f32 %v1601_v52  ;;  %v1596_v54 = vsub.f32 %v1577_v33, %v1592_v53 }
 0x8ac   : > { %v1603_v55 = vmul.f32 1.442695, %v1596_v54 }
 0x8ae   : > { %3418 = vpow2.f32 %v1603_v55 }
 0x8b4   : > { %v3417_v56 = vpop.eup %3416 }
 0x8b5   : > { %v1611_v57 = vsel %vm1079_vm2, %v3417_v56, 0.0 }
 0x8b6   : > { %1612 = vadd.xlane.f32.xlu0 %v1611_v57 }
 0x8b8   : > { %v3419_v59 = vpop.eup %3418 }
 0x8b9   : > { %v1614_v60 = vsel %vm1079_vm2, %v3419_v59, 0.0 }
 0x8ba   : > { %1615 = vadd.xlane.f32.xlu1 %v1614_v60 }
 0x8cb   : > { %1787 = vrot.lane.b32.xlu1 %v4085_v49, %s3687_s27 }
 0x8cc   : > { %1627 = vrot.lane.b32.xlu0 %v4109_v3, %s3686_s28 }
 0x8cf   : > { %1785 = vrot.lane.b32.xlu1 %v4083_v48, %s3687_s27 }
 0x8d0   : > { %1734 = vrot.lane.b32.xlu0 %v4087_v50, %s3687_s27 }
 0x903   : > { %v1607_v63 = vpop.xlane.xlu0 %1606 }
 0x905   : > { %v1610_v51 = vpop.xlane.xlu1 %1609 }
 0x906   : > { %3420 = vrcp.f32 %v1610_v51 }
 0x907   : > { %3422 = vrcp.f32 %v1607_v63 }
 0x909   : > { %v1675_v61 = vpop.permute.xlu1 %1674 }
 0x90a   : > { %3159 = vmatpush3.bf16.msra.mxu1 %v1675_v61 }
 0x90b   : > { %3170 = vmatprep.subr.bf16.mxu1 %v3683_v27 }
 0x90d   : > { %v1737_v1 = vpop.permute.xlu1 %1736 }
 0x90e   : > { %v1742_v8 = vsel %vm984_vm1, %v1737_v1, 0 }
 0x910   : > { %v3421_v0 = vpop.eup %3420 }
 0x911   : > { %v3423_v4 = vpop.eup %3422  ;;  %v1622_v5 = vmul.f32 %v3421_v0, %v3415_v44 }
 0x912   : > { %v1621_v62 = vmul.f32 %v3423_v4, %v3413_v42 }
 0x914   : > { %v1625_v50 = vpack.c.bf16 %v1622_v5, %v1621_v62 }
 0x943   : > { %v1613_v49 = vpop.xlane.xlu0 %1612 }
 0x944   : > { %3424 = vrcp.f32 %v1613_v49 }
 0x947   : > { %v1616_v6 = vpop.xlane.xlu1 %1615  ;;  %v1628_v48 = vpop.permute.xlu0 %1627 }
 0x948   : > { %3426 = vrcp.f32 %v1616_v6  ;;  %3153 = vmatpush3.bf16.msra.mxu0 %v1628_v48 }
 0x949   : > { %3164 = vmatprep.subr.bf16.mxu0 %v3683_v27 }
 0x94b   : > { %3155 = vmatmul.mubr.msk.bf16.vlgmr.msra.gmra.mrb[12].mxu0 %vm1079_vm2, %v1625_v50  ;;  %v1788_v13 = vpop.permute.xlu1 %1787  ;;  %v1735_v18 = vpop.permute.xlu0 %1734 }
 0x94c   : > { %3166 = vmatprep.mubr.msk.bf16.mxu0 %vm3684_vm0, %v3683_v27  ;;  %v1793_v16 = vsel %vm984_vm1, %v1788_v13, 0 }
 0x94e   : > { %v3425_v7 = vpop.eup %3424 }
 0x94f   : > { %v1623_v10 = vmul.f32 %v3425_v7, %v3417_v56  ;;  %v1786_v19 = vpop.permute.xlu1 %1785 }
 0x951   : > { %3165 = vmatpush3.bf16.xpose.msra.mxu0 %v1742_v8 }
 0x952   : > { %v3427_v9 = vpop.eup %3426  ;;  %3176 = vmatprep.subr.bf16.mxu0 %v3683_v27 }
 0x953   : > { %v1624_v12 = vmul.f32 %v3427_v9, %v3419_v59 }
 0x955   : > { %v1626_v15 = vpack.c.bf16 %v1624_v12, %v1623_v10 }
 0x957   : > { %3161 = vmatmul.mubr.msk.bf16.vlgmr.msra.gmra.mrb[40].mxu1 %vm1079_vm2, %v1626_v15 }
 0x958   : > { %3171 = vmatpush3.bf16.xpose.msra.mxu1 %v1793_v16  ;;  %3167 = vmatmul.mubr.msk.bf16.vlgmr.msra.gmra.mrb[16].mxu0 %vm984_vm1, %v1735_v18 }
 0x959   : > { %3172 = vmatprep.mubr.msk.bf16.mxu1 %vm3684_vm0, %v3683_v27  ;;  %3182 = vmatprep.subr.bf16.mxu1 %v3683_v27 }
 0x95a   : > { %3178 = vmatprep.mubr.msk.bf16.mxu0 %vm3684_vm0, %v3683_v27 }
 0x95f   : > { %3173 = vmatmul.mubr.msk.bf16.vlgmr.msra.gmra.mrb[44].mxu1 %vm984_vm1, %v1786_v19 }
 0x960   : > { %3184 = vmatprep.mubr.msk.bf16.mxu1 %vm3684_vm0, %v3683_v27 }
 0xa1e   : > { %v1667_v20 = vpop.f32.mrb[12].mxu0 }
 0xa1f   : > { %v3156_v21 = vpop.f32.mrb[13].mxu0 }
 0xa20   : > { %v1670_v23 = vpop.f32.mrb[14].mxu0  ;;  %v3324_v21 = vld [vmem:[%s3969_s24] sm:$0xff]  }
 0xa21   : > { %v1721_v26 = vpack.c.bf16 %v1670_v23, %v1667_v20  ;;  %v3157_v30 = vpop.f32.mrb[15].mxu0  ;;  %v3325_v23 = vld [vmem:[%s3969_s24 + $0x8] sm:$0xff]  }
 0xa22   : > { %v3327_v30 = vld [vmem:[%s3969_s24 + $0x18] sm:$0xff]  }
 0xa2a   : > { %v1714_v31 = vpop.f32.mrb[40].mxu1 }
 0xa2b   : > { %v3162_v32 = vpop.f32.mrb[41].mxu1  ;;  %v1778_v33 = vpop.f32.mrb[16].mxu0 }
 0xa2c   : > { %v1717_v34 = vpop.f32.mrb[42].mxu1  ;;  %v3168_v35 = vpop.f32.mrb[17].mxu0  ;;  %v1836_v36 = vsel %vm1079_vm2, %v1778_v33, -inf  ;;  %v3329_v32 = vld [vmem:[%s3969_s24 + $0x28] sm:$0xff]  }
 0xa2d   : > { %v1722_v37 = vpack.c.bf16 %v1717_v34, %v1714_v31  ;;  %1837 = vmax.xlane.f32.xlu0 %v1836_v36  ;;  %v3163_v38 = vpop.f32.mrb[43].mxu1  ;;  %v1781_v39 = vpop.f32.mrb[18].mxu0  ;;  %v3328_v31 = vld [vmem:[%s3969_s24 + $0x20] sm:$0xff]   ;;  %v3330_v34 = vld [vmem:[%s3969_s24 + $0x30] sm:$0xff]   ;;  %v3331_v36 = vld [vmem:[%s3969_s24 + $0x38] sm:$0xff]  }
 0xa2e   : > { %v3169_v40 = vpop.f32.mrb[19].mxu0  ;;  %v1839_v41 = vsel %vm1079_vm2, %v1781_v39, -inf }
 0xa2f   : > { %1840 = vmax.xlane.f32.xlu1 %v1839_v41 }
 0xa32   : > { %v1829_v27 = vpop.f32.mrb[44].mxu1 }
 0xa33   : > { %v3174_v42 = vpop.f32.mrb[45].mxu1  ;;  %v1842_v43 = vsel %vm1079_vm2, %v1829_v27, -inf }
 0xa34   : > { %1843 = vmax.xlane.f32.xlu0 %v1842_v43  ;;  %v1832_v44 = vpop.f32.mrb[46].mxu1 }
 0xa35   : > { %v3175_v45 = vpop.f32.mrb[47].mxu1  ;;  %v1845_v46 = vsel %vm1079_vm2, %v1832_v44, -inf }
 0xa38   : > { %1846 = vmax.xlane.f32.xlu0 %v1845_v46 }
 0xaba   : > { %v1838_v47 = vpop.xlane.xlu0 %1837 }
 0xabb   : > { %v1848_v52 = vsub.f32 %v1778_v33, %v1838_v47 }
 0xabc   : > { %v1841_v53 = vpop.xlane.xlu1 %1840 }
 0xabd   : > { %v1852_v54 = vmul.f32 1.442695, %v1848_v52  ;;  %v1849_v55 = vsub.f32 %v1781_v39, %v1841_v53  ;;  %v2009_v52 = vsub.s32 3, %v4047_v58  ;;  %v4273_v53 = vld [vmem:[%s3988_s25] sm:$0xff] }
 0xabf   : > { %3428 = vpow2.f32 %v1852_v54  ;;  %v1854_v56 = vmul.f32 1.442695, %v1849_v55  ;;  %v2010_v54 = vrot.slane %v4273_v53, %v2009_v52  ;;  %v3365_v52 = vld [vmem:[%s3977_s18 + $0x20] sm:$0xff]  }
 0xac1   : > { %3430 = vpow2.f32 %v1854_v56  ;;  %v1844_v57 = vpop.xlane.xlu0 %1843 }
 0xac2   : > { %v1850_v59 = vsub.f32 %v1829_v27, %v1844_v57 }
 0xac4   : > { %v1856_v60 = vmul.f32 1.442695, %v1850_v59 }
 0xac5   : > { %v1847_v51 = vpop.xlane.xlu0 %1846 }
 0xac6   : > { %3432 = vpow2.f32 %v1856_v60  ;;  %v1851_v61 = vsub.f32 %v1832_v44, %v1847_v51 }
 0xac8   : > { %v1858_v63 = vmul.f32 1.442695, %v1851_v61  ;;  %v3453_v61 = vld [vmem:[#allocation11] sm:$0xff] }
 0xac9   : > { %v3429_v0 = vpop.eup %3428 }
 0xaca   : > { %3434 = vpow2.f32 %v1858_v63  ;;  %v1860_v1 = vsel %vm1079_vm2, %v3429_v0, 0.0 }
 0xacb   : > { %v3431_v49 = vpop.eup %3430  ;;  %1861 = vadd.xlane.f32.xlu0 %v1860_v1  ;;  %v3454_v1 = vld [vmem:[#allocation11 + $0x8] sm:$0xff] }
 0xacc   : > { %v1863_v4 = vsel %vm1079_vm2, %v3431_v49, 0.0 }
 0xacd   : > { %1864 = vadd.xlane.f32.xlu1 %v1863_v4  ;;  %v3455_v4 = vld [vmem:[#allocation11 + $0x10] sm:$0xff] }
 0xad0   : > { %v3433_v5 = vpop.eup %3432 }
 0xad1   : > { %v1866_v62 = vsel %vm1079_vm2, %v3433_v5, 0.0 }
 0xad2   : > { %1867 = vadd.xlane.f32.xlu0 %v1866_v62 }
 0xad4   : > { %v3435_v6 = vpop.eup %3434 }
 0xad5   : > { %v1869_v48 = vsel %vm1079_vm2, %v3435_v6, 0.0 }
 0xad6   : > { %1870 = vadd.xlane.f32.xlu1 %v1869_v48 }
 0xae7   : > { %1929 = vrot.lane.b32.xlu1 %v4107_v2, %s3687_s27 }
 0xae8   : > { %1882 = vrot.lane.b32.xlu0 %v4109_v3, %s3687_s27 }
 0xaeb   : > { %1470 = vrot.lane.b32.xlu1 %v1466_v17, %s3687_s27 }
 0xaec   : > { %1725 = vrot.lane.b32.xlu0 %v1721_v26, %s3686_s28  ;;  %v3326_v26 = vld [vmem:[%s3969_s24 + $0x10] sm:$0xff]  }
 0xaef   : > { %1472 = vrot.lane.b32.xlu1 %v1467_v25, %s3687_s27 }
 0xaf3   : > { %1727 = vrot.lane.b32.xlu1 %v1722_v37, %s3686_s28 }
 0xb58   : > { %v1862_v50 = vpop.xlane.xlu0 %1861 }
 0xb59   : > { %3436 = vrcp.f32 %v1862_v50  ;;  %v3332_v50 = vld [vmem:[%s3975_s3] ss:$8 sps:$4 sm:$0xff]  }
 0xb5a   : > { %v1865_v2 = vpop.xlane.xlu1 %1864 }
 0xb5b   : > { %3438 = vrcp.f32 %v1865_v2  ;;  %v3334_v2 = vld [vmem:[%s3975_s3 + $0x4] ss:$8 sps:$4 sm:$0xff]  }
 0xb5f   : > { %v1868_v7 = vpop.xlane.xlu0 %1867 }
 0xb60   : > { %3440 = vrcp.f32 %v1868_v7  ;;  %v3337_v7 = vld [vmem:[%s3975_s3 + $0x14] ss:$8 sps:$4 sm:$0xff]  }
 0xb63   : > { %v3437_v3 = vpop.eup %3436  ;;  %v1871_v8 = vpop.xlane.xlu1 %1870 }
 0xb64   : > { %v1883_v9 = vpop.permute.xlu0 %1882  ;;  %3442 = vrcp.f32 %v1871_v8  ;;  %v1876_v14 = vmul.f32 %v3437_v3, %v3429_v0  ;;  %v3335_v3 = vld [vmem:[%s3975_s3 + $0x10] ss:$8 sps:$4 sm:$0xff]  }
 0xb65   : > { %3177 = vmatpush3.bf16.msra.mxu0 %v1883_v9  ;;  %v3439_v11 = vpop.eup %3438 }
 0xb66   : > { %v1877_v17 = vmul.f32 %v3439_v11, %v3431_v49  ;;  %3188 = vmatprep.subr.bf16.mxu0 %v3324_v21 }
 0xb67   : > { %v1930_v10 = vpop.permute.xlu1 %1929 }
 0xb68   : > { %3183 = vmatpush3.bf16.msra.mxu1 %v1930_v10  ;;  %v1880_v22 = vpack.c.bf16 %v1877_v17, %v1876_v14  ;;  %v1726_v12 = vpop.permute.xlu0 %1725 }
 0xb69   : > { %2281 = vmatprep.subr.bf16.mxu1 %v3334_v2 }
 0xb6a   : > { %3179 = vmatmul.mubr.msk.bf16.vlgmr.msra.gmra.mrb[20].mxu0 %vm1079_vm2, %v1880_v22  ;;  %v3441_v25 = vpop.eup %3440 }
 0xb6b   : > { %v1471_v24 = vpop.permute.xlu1 %1470  ;;  %v1878_v15 = vmul.f32 %v3441_v25, %v3433_v5  ;;  %3189 = vmatpush3.bf16.msra.mxu0 %v3324_v21  ;;  %v3340_v21 = vld [vmem:[%s3975_s3 + $0x24] ss:$8 sps:$4 sm:$0xff]  }
 0xb6c   : > { %1477 = vst.msk [vmem:[#allocation2] sm:$0xff] %vm1476_vm3, %v1471_v24  ;;  %3190 = vmatprep.subr.bf16.mxu0 %v3325_v23 }
 0xb6d   : > { %1732 = vst.msk [vmem:[#allocation2] sm:$0xff] %vm1731_vm4, %v1726_v12 }
 0xb6e   : > { %v3443_v13 = vpop.eup %3442 }
 0xb6f   : > { %v1879_v16 = vmul.f32 %v3443_v13, %v3435_v6  ;;  %v1473_v18 = vpop.permute.xlu1 %1472  ;;  %3191 = vmatpush3.bf16.msra.mxu0 %v3325_v23  ;;  %v3456_v6 = vld [vmem:[#allocation11 + $0x18] sm:$0xff]  ;;  %v3338_v23 = vld [vmem:[%s3975_s3 + $0x20] ss:$8 sps:$4 sm:$0xff]  }
 0xb70   : > { %1478 = vst.msk [vmem:[#allocation2 + $0x8] sm:$0xff] %vm1476_vm3, %v1473_v18  ;;  %3192 = vmatprep.subr.bf16.mxu0 %v3326_v26 }
 0xb71   : > { %v1881_v19 = vpack.c.bf16 %v1879_v16, %v1878_v15 }
 0xb73   : > { %v1728_v20 = vpop.permute.xlu1 %1727  ;;  %3185 = vmatmul.mubr.msk.bf16.vlgmr.msra.gmra.mrb[48].mxu1 %vm1079_vm2, %v1881_v19  ;;  %3193 = vmatpush3.bf16.msra.mxu0 %v3326_v26  ;;  %v3343_v26 = vld [vmem:[%s3975_s3 + $0x34] ss:$8 sps:$4 sm:$0xff]  }
 0xb74   : > { %1733 = vst.msk [vmem:[#allocation2 + $0x8] sm:$0xff] %vm1731_vm4, %v1728_v20  ;;  %3194 = vmatprep.subr.bf16.mxu0 %v3327_v30  ;;  %2282 = vmatpush1.bf16.msra.mxu1 %v3332_v50 }
 0xb75   : > { %2283 = vmatprep.subr.bf16.mxu1 %v3337_v7 }
 0xb77   : > { %3195 = vmatpush3.bf16.msra.mxu0 %v3327_v30  ;;  %v3341_v30 = vld [vmem:[%s3975_s3 + $0x30] ss:$8 sps:$4 sm:$0xff]  }
 0xb78   : > { %3196 = vmatprep.subr.bf16.mxu0 %v3328_v31  ;;  %2284 = vmatpush1.bf16.msra.mxu1 %v3335_v3 }
 0xb79   : > { %2285 = vmatprep.subr.bf16.mxu1 %v3340_v21 }
 0xb7b   : > { %3197 = vmatpush3.bf16.msra.mxu0 %v3328_v31  ;;  %v3346_v31 = vld [vmem:[%s3975_s3 + $0x44] ss:$8 sps:$4 sm:$0xff]  }
 0xb7c   : > { %3198 = vmatprep.subr.bf16.mxu0 %v3329_v32  ;;  %2286 = vmatpush1.bf16.msra.mxu1 %v3338_v23 }
 0xb7d   : > { %2287 = vmatprep.subr.bf16.mxu1 %v3343_v26 }
 0xb7f   : > { %3199 = vmatpush3.bf16.msra.mxu0 %v3329_v32  ;;  %v3344_v32 = vld [vmem:[%s3975_s3 + $0x40] ss:$8 sps:$4 sm:$0xff]  }
 0xb80   : > { %3200 = vmatprep.subr.bf16.mxu0 %v3330_v34  ;;  %2288 = vmatpush1.bf16.msra.mxu1 %v3341_v30  ;;  %v3367_v30 = vld [vmem:[%s3977_s18 + $0x28] sm:$0xff]  }
 0xb81   : > { %2289 = vmatprep.subr.bf16.mxu1 %v3346_v31  ;;  %v3368_v31 = vld [vmem:[%s3977_s18 + $0x70] sm:$0xff]  }
 0xb83   : > { %3201 = vmatpush3.bf16.msra.mxu0 %v3330_v34  ;;  %v3347_v34 = vld [vmem:[%s3975_s3 + $0x50] ss:$8 sps:$4 sm:$0xff]  }
 0xb84   : > { %3202 = vmatprep.subr.bf16.mxu0 %v3331_v36  ;;  %2290 = vmatpush1.bf16.msra.mxu1 %v3344_v32  ;;  %v3369_v32 = vld [vmem:[%s3977_s18 + $0x30] sm:$0xff]  }
 0xb87   : > { %3203 = vmatpush3.bf16.msra.mxu0 %v3331_v36  ;;  %v3350_v36 = vld [vmem:[%s3975_s3 + $0x60] ss:$8 sps:$4 sm:$0xff]  }
 0xc3d   : > { %v1922_v33 = vpop.f32.mrb[20].mxu0 }
 0xc3e   : > { %v3180_v35 = vpop.f32.mrb[21].mxu0 }
 0xc3f   : > { %v1925_v37 = vpop.f32.mrb[22].mxu0  ;;  %v3352_v35 = vld [vmem:[%s3975_s3 + $0x64] ss:$8 sps:$4 sm:$0xff]  }
 0xc40   : > { %v1976_v38 = vpack.c.bf16 %v1925_v37, %v1922_v33  ;;  %v3181_v39 = vpop.f32.mrb[23].mxu0  ;;  %v3349_v33 = vld [vmem:[%s3975_s3 + $0x54] ss:$8 sps:$4 sm:$0xff]  }
 0xc41   : > { %2291 = vmatprep.subr.bf16.mxu1 %v3349_v33  ;;  %v3355_v37 = vld [vmem:[%s3975_s3 + $0x74] ss:$8 sps:$4 sm:$0xff]   ;;  %v3688_v39 = vmov 0  }
 0xc42   : > { %1980 = vrot.lane.b32.xlu0 %v1976_v38, %s3685_s17  ;;  %2292 = vmatpush1.bf16.msra.mxu1 %v3347_v34  ;;  %v3353_v38 = vld [vmem:[%s3975_s3 + $0x70] ss:$8 sps:$4 sm:$0xff]  }
 0xc43   : > { %2293 = vmatprep.subr.bf16.mxu1 %v3352_v35  ;;  %2313 = vmatprep.mubr.bf16.mxu1 %v3688_v39  ;;  %v3371_v33 = vld [vmem:[%s3977_s18 + $0x38] sm:$0xff]  }
 0xc46   : > { %v1969_v40 = vpop.f32.mrb[48].mxu1  ;;  %2294 = vmatpush1.bf16.msra.mxu1 %v3350_v36 }
 0xc47   : > { %v3186_v41 = vpop.f32.mrb[49].mxu1  ;;  %2295 = vmatprep.subr.bf16.mxu1 %v3355_v37 }
 0xc48   : > { %v1972_v27 = vpop.f32.mrb[50].mxu1  ;;  %v3357_v41 = vld [vmem:[%s3977_s18] sm:$0xff]  }
 0xc49   : > { %v1977_v42 = vpack.c.bf16 %v1972_v27, %v1969_v40  ;;  %v3187_v43 = vpop.f32.mrb[51].mxu1  ;;  %v3356_v40 = vld [vmem:[%s3977_s18 + $0x40] sm:$0xff]   ;;  %v3358_v27 = vld [vmem:[%s3977_s18 + $0x48] sm:$0xff]  }
 0xc4a   : > { %2296 = vmatpush1.bf16.msra.mxu1 %v3353_v38  ;;  %3004 = vmatprep.subr.bf16.mxu0 %v3356_v40  ;;  %v3360_v43 = vld [vmem:[%s3977_s18 + $0x50] sm:$0xff]  }
 0xc4b   : > { %1982 = vrot.lane.b32.xlu1 %v1977_v42, %s3685_s17  ;;  %v3359_v42 = vld [vmem:[%s3977_s18 + $0x8] sm:$0xff]  }
 0xcb4   : > { %v1981_v44 = vpop.permute.xlu0 %1980 }
 0xcb5   : > { %1987 = vst.msk [vmem:[#allocation2] sm:$0xff] %vm1986_vm5, %v1981_v44  ;;  %v3361_v44 = vld [vmem:[%s3977_s18 + $0x10] sm:$0xff]  }
 0xcbc   : > { %v1989_v45 = vld [vmem:[#allocation2] sm:$0xff] }
 0xcbd   : > { %3204 = vmatprep.mubr.bf16.mxu0 %v1989_v45  ;;  %v1983_v46 = vpop.permute.xlu1 %1982  ;;  %v3362_v45 = vld [vmem:[%s3977_s18 + $0x58] sm:$0xff]  }
 0xcbe   : > { %1988 = vst.msk [vmem:[#allocation2 + $0x8] sm:$0xff] %vm1986_vm5, %v1983_v46  ;;  %v3363_v46 = vld [vmem:[%s3977_s18 + $0x18] sm:$0xff]  }
 0xcc5   : > { %v1990_v47 = vld [vmem:[#allocation2 + $0x8] sm:$0xff] }
 0xcc6   : > { %3205 = vmatmul.mubr.bf16.vlgmr.msra.gmra.mrb[24].mxu0 %v1990_v47  ;;  %v3364_v47 = vld [vmem:[%s3977_s18 + $0x60] sm:$0xff]  }
 0xcc7   : > { %3005 = vmatpush3.bf16.msra.mxu0 %v3357_v41 }
 0xcc8   : > { %3006 = vmatprep.subr.bf16.mxu0 %v3358_v27 }
 0xccb   : > { %3007 = vmatpush3.bf16.msra.mxu0 %v3359_v42 }
 0xccc   : > { %3008 = vmatprep.subr.bf16.mxu0 %v3360_v43 }
 0xccf   : > { %3009 = vmatpush3.bf16.msra.mxu0 %v3361_v44 }
 0xcd0   : > { %3010 = vmatprep.subr.bf16.mxu0 %v3362_v45 }
 0xcd3   : > { %3011 = vmatpush3.bf16.msra.mxu0 %v3363_v46 }
 0xcd4   : > { %3012 = vmatprep.subr.bf16.mxu0 %v3364_v47 }
 0xcd7   : > { %3013 = vmatpush3.bf16.msra.mxu0 %v3365_v52 }
 0xd99   : > { %v3206_v55 = vpop.f32.mrb[24].mxu0 }
 0xd9a   : > { %v2093_v56 = vpop.f32.mrb[25].mxu0  ;;  %v2102_v51 = vadd.f32 %v3206_v55, %v2010_v54 }
 0xd9b   : > { %v2094_v57 = vadd.f32 %v2093_v56, %v2010_v54  ;;  %v3207_v59 = vpop.f32.mrb[26].mxu0 }
 0xd9c   : > { %v2096_v60 = vpop.f32.mrb[27].mxu0  ;;  %v4281_v5 = vadd.f32 %v3455_v4, %v2102_v51  ;;  %v2105_v62 = vadd.f32 %v3207_v59, %v2010_v54 }
 0xd9d   : > { %v4276_v63 = vadd.f32 %v3453_v61, %v2094_v57  ;;  %v2097_v0 = vadd.f32 %v2096_v60, %v2010_v54  ;;  %v3366_v54 = vld [vmem:[%s3977_s18 + $0x68] sm:$0xff]  }
 0xd9e   : > { %v4285_v48 = vadd.f32 %v3456_v6, %v2105_v62  ;;  %3014 = vmatprep.subr.bf16.mxu0 %v3366_v54  ;;  %v2158_v6 = vsub.s32 7, %v4047_v58 }
 0xd9f   : > { %v4278_v49 = vadd.f32 %v3454_v1, %v2097_v0  ;;  %2112 = vadd.xlane.f32.xlu0 %v4276_v63  ;;  %3015 = vmatpush3.bf16.msra.mxu0 %v3367_v30 }
 0xda0   : > { %v2159_v2 = vrot.slane %v4273_v53, %v2158_v6  ;;  %3016 = vmatprep.subr.bf16.mxu0 %v3368_v31 }
 0xda1   : > { %2114 = vadd.xlane.f32.xlu1 %v4278_v49 }
 0xda3   : > { %2116 = vadd.xlane.f32.xlu0 %v4281_v5  ;;  %3017 = vmatpush3.bf16.msra.mxu0 %v3369_v32 }
 0xda7   : > { %2118 = vadd.xlane.f32.xlu0 %v4285_v48 }
 0xe2c   : > { %v2113_v8 = vpop.xlane.xlu0 %2112 }
 0xe2d   : > { %v2120_v9 = vmul.f32 0.0078125, %v2113_v8 }
 0xe2e   : > { %v2115_v11 = vpop.xlane.xlu1 %2114 }
 0xe2f   : > { %v4293_v14 = vsub.f32 %v4276_v63, %v2120_v9  ;;  %v2121_v17 = vmul.f32 0.0078125, %v2115_v11 }
 0xe30   : > { %v2117_v10 = vpop.xlane.xlu0 %2116 }
 0xe31   : > { %v4296_v22 = vsub.f32 %v4278_v49, %v2121_v17  ;;  %v2122_v24 = vmul.f32 0.0078125, %v2117_v10  ;;  %v2128_v25 = vmul.f32 %v4293_v14, %v4293_v14  ;;  %v2889_v10 = vld [vmem:[%s3988_s25 + $0x8] ss:$0 sm:$0xff] }
 0xe33   : > { %v4301_v12 = vsub.f32 %v4281_v5, %v2122_v24  ;;  %2132 = vadd.xlane.f32.xlu0 %v2128_v25  ;;  %v2129_v13 = vmul.f32 %v4296_v22, %v4296_v22 }
 0xe34   : > { %v2119_v15 = vpop.xlane.xlu0 %2118 }
 0xe35   : > { %v2123_v16 = vmul.f32 0.0078125, %v2119_v15  ;;  %2134 = vadd.xlane.f32.xlu1 %v2129_v13  ;;  %v2130_v18 = vmul.f32 %v4301_v12, %v4301_v12 }
 0xe37   : > { %v4308_v19 = vsub.f32 %v4285_v48, %v2123_v16  ;;  %2136 = vadd.xlane.f32.xlu0 %v2130_v18 }
 0xe39   : > { %v2131_v20 = vmul.f32 %v4308_v19, %v4308_v19 }
 0xe3b   : > { %2138 = vadd.xlane.f32.xlu1 %v2131_v20 }
 0xec0   : > { %v2133_v55 = vpop.xlane.xlu0 %2132 }
 0xec1   : > { %v2140_v56 = vmul.f32 0.0078125, %v2133_v55 }
 0xec2   : > { %v2135_v57 = vpop.xlane.xlu1 %2134 }
 0xec3   : > { %v2144_v59 = vadd.f32 1e-06, %v2140_v56  ;;  %v2141_v60 = vmul.f32 0.0078125, %v2135_v57 }
 0xec4   : > { %v2137_v51 = vpop.xlane.xlu0 %2136 }
 0xec5   : > { %3444 = vrsqrt.f32 %v2144_v59  ;;  %v2145_v61 = vadd.f32 1e-06, %v2141_v60  ;;  %v2142_v0 = vmul.f32 0.0078125, %v2137_v51 }
 0xec7   : > { %3446 = vrsqrt.f32 %v2145_v61  ;;  %v2146_v1 = vadd.f32 1e-06, %v2142_v0 }
 0xec8   : > { %v2139_v4 = vpop.xlane.xlu1 %2138 }
 0xec9   : > { %3448 = vrsqrt.f32 %v2146_v1  ;;  %v2143_v62 = vmul.f32 0.0078125, %v2139_v4 }
 0xecb   : > { %v2147_v50 = vadd.f32 1e-06, %v2143_v62 }
 0xecd   : > { %3450 = vrsqrt.f32 %v2147_v50 }
 0xecf   : > { %v3445_v7 = vpop.eup %3444 }
 0xed0   : > { %v2152_v3 = vmul.f32 %v3445_v7, %v4293_v14 }
 0xed1   : > { %v3447_v8 = vpop.eup %3446 }
 0xed2   : > { %v2153_v9 = vmul.f32 %v3447_v8, %v4296_v22  ;;  %v2160_v11 = vmul.f32 %v2159_v2, %v2152_v3 }
 0xed3   : > { %v3449_v17 = vpop.eup %3448 }
 0xed4   : > { %v2161_v24 = vmul.f32 %v2159_v2, %v2153_v9  ;;  %v2168_v25 = vadd.f32 %v2889_v10, %v2160_v11  ;;  %v2154_v15 = vmul.f32 %v3449_v17, %v4301_v12  ;;  %v3370_v12 = vld [vmem:[%s3977_s18 + $0x78] sm:$0xff]  }
 0xed5   : > { %3018 = vmatprep.subr.bf16.mxu0 %v3370_v12 }
 0xed6   : > { %v2169_v13 = vadd.f32 %v2889_v10, %v2161_v24  ;;  %v2162_v14 = vmul.f32 %v2159_v2, %v2154_v15  ;;  %3019 = vmatpush3.bf16.msra.mxu0 %v3371_v33 }
 0xed7   : > { %v3451_v16 = vpop.eup %3450 }
 0xed8   : > { %v2172_v18 = vpack.c.bf16 %v2169_v13, %v2168_v25  ;;  %v2155_v20 = vmul.f32 %v3451_v16, %v4308_v19  ;;  %v2170_v23 = vadd.f32 %v2889_v10, %v2162_v14  ;;  %v561_v19 = vld [vmem:[%s3993_s9] sm:$0x3] }
 0xed9   : > { %v2194_v34 = vrot.slane %v561_v19, %v4074_v28  ;;  %v2198_v35 = vrot.slane %v561_v19, %v4077_v29 }
 0xeda   : > { %2314 = vmatmul.mubr.bf16.vlgmr.msra.gmra.mrb[52].mxu1 %v2172_v18  ;;  %v2163_v22 = vmul.f32 %v2159_v2, %v2155_v20  ;;  %v2380_v2 = vsub.s32 4, %v4047_v58 }
 0xedb   : > { %2323 = vmatprep.mubr.bf16.mxu1 %v3688_v39 }
 0xedc   : > { %v2171_v21 = vadd.f32 %v2889_v10, %v2163_v22  ;;  %v2381_v3 = vrot.slane %v4273_v53, %v2380_v2 }
 0xede   : > { %v2173_v26 = vpack.c.bf16 %v2171_v21, %v2170_v23 }
 0xee2   : > { %2324 = vmatmul.mubr.bf16.gmra.mrb[56].mxu1 %v2173_v26 }
 0xfad   : > { %v2315_v36 = vpop.f32.mrb[52].mxu1 }
 0xfae   : > { %v2316_v37 = vadd.f32 %v2315_v36, %v2194_v34  ;;  %v2317_v38 = vpop.f32.mrb[53].mxu1 }
 0xfaf   : > { %v2318_v39 = vadd.f32 %v2317_v38, %v2198_v35  ;;  %v2319_v40 = vpop.f32.mrb[54].mxu1 }
 0xfb0   : > { %v2320_v41 = vadd.f32 %v2319_v40, %v2194_v34  ;;  %v2321_v27 = vpop.f32.mrb[55].mxu1  ;;  %v2334_v43 = vmax.f32 %v2316_v37, 0.0 }
 0xfb1   : > { %v2322_v42 = vadd.f32 %v2321_v27, %v2198_v35  ;;  %v2335_v45 = vmax.f32 %v2318_v39, 0.0 }
 0xfb2   : > { %v2336_v44 = vmax.f32 %v2320_v41, 0.0 }
 0xfb3   : > { %v2337_v46 = vmax.f32 %v2322_v42, 0.0 }
 0xfb4   : > { %v2342_v47 = vpack.c.bf16 %v2336_v44, %v2334_v43 }
 0xfb5   : > { %v2343_v52 = vpack.c.bf16 %v2337_v46, %v2335_v45  ;;  %v2325_v54 = vpop.f32.mrb[56].mxu1 }
 0xfb6   : > { %v2326_v55 = vadd.f32 %v2325_v54, %v2194_v34  ;;  %v2327_v56 = vpop.f32.mrb[57].mxu1 }
 0xfb7   : > { %v2328_v57 = vadd.f32 %v2327_v56, %v2198_v35  ;;  %v2329_v59 = vpop.f32.mrb[58].mxu1  ;;  %2510 = vmatprep.mubr.bf16.mxu0 %v2343_v52 }
 0xfb8   : > { %v2330_v60 = vadd.f32 %v2329_v59, %v2194_v34  ;;  %v2331_v51 = vpop.f32.mrb[59].mxu1  ;;  %2511 = vmatmul.mubr.bf16.vlgmr.msra.gmra.mrb[28].mxu0 %v2342_v47  ;;  %v2338_v0 = vmax.f32 %v2326_v55, 0.0 }
 0xfb9   : > { %v2332_v61 = vadd.f32 %v2331_v51, %v2198_v35  ;;  %v2339_v4 = vmax.f32 %v2328_v57, 0.0 }
 0xfba   : > { %v2340_v1 = vmax.f32 %v2330_v60, 0.0 }
 0xfbb   : > { %v2341_v62 = vmax.f32 %v2332_v61, 0.0 }
 0xfbc   : > { %v2344_v6 = vpack.c.bf16 %v2340_v1, %v2338_v0 }
 0xfbd   : > { %v2345_v50 = vpack.c.bf16 %v2341_v62, %v2339_v4 }
 0xfbf   : > { %2518 = vmatprep.mubr.bf16.mxu0 %v2345_v50 }
 0xfc0   : > { %2519 = vmatmul.mubr.bf16.gmra.mrb[32].mxu0 %v2344_v6 }
0x108b   : > { %v3020_v7 = vpop.f32.mrb[28].mxu0 }
0x108c   : > { %v3021_v8 = vpop.f32.mrb[29].mxu0 }
0x108d   : > { %v3022_v9 = vadd.f32 %v3021_v8, %v3020_v7  ;;  %v3023_v11 = vpop.f32.mrb[30].mxu0 }
0x108e   : > { %v3024_v17 = vpop.f32.mrb[31].mxu0 }
0x108f   : > { %v2513_v10 = vadd.f32 %v3022_v9, %v2381_v3  ;;  %v3025_v24 = vadd.f32 %v3024_v17, %v3023_v11 }
0x1091   : > { %v2527_v25 = vadd.f32 %v2513_v10, %v4276_v63  ;;  %v2516_v13 = vadd.f32 %v3025_v24, %v2381_v3 }
0x1093   : > { %v2528_v15 = vadd.f32 %v2516_v13, %v4278_v49  ;;  %v3026_v16 = vpop.f32.mrb[32].mxu0  ;;  %2535 = vst [vmem:[#allocation11] sm:$0xff] (!%p2922_p6), %v2527_v25 }
0x1094   : > { %v3027_v18 = vpop.f32.mrb[33].mxu0 }
0x1095   : > { %v3028_v20 = vadd.f32 %v3027_v18, %v3026_v16  ;;  %v3029_v14 = vpop.f32.mrb[34].mxu0  ;;  %2534 = sbr.rel (%p2922_p6) target bundleno = 4254 (0x109e), region = 80  ;;  %2536 = vst [vmem:[#allocation11 + $0x8] sm:$0xff] (!%p2922_p6), %v2528_v15 }
0x1096   : > { %v3030_v22 = vpop.f32.mrb[35].mxu0 }
0x1097   : > { %v2521_v58 = vadd.f32 %v3028_v20, %v2381_v3  ;;  %v3031_v21 = vadd.f32 %v3030_v22, %v3029_v14 }
0x1099   : > { %v2529_v53 = vadd.f32 %v2521_v58, %v4281_v5  ;;  %v2524_v23 = vadd.f32 %v3031_v21, %v2381_v3 }
0x109b   : > { %v2530_v26 = vadd.f32 %v2524_v23, %v4285_v48  ;;  %2537 = vst [vmem:[#allocation11 + $0x10] sm:$0xff] (!%p2922_p6), %v2529_v53 }
0x109d   : > { %2538 = vst [vmem:[#allocation11 + $0x18] sm:$0xff] %v2530_v26 }
0x109e PF: > { %p2923_p8 = scmp.ne.s32.totalorder %s3665_s12, 1 }
0x109f   : > { %2544 = vadd.xlane.f32.xlu0 (!%p2923_p8), %v2527_v25  ;;  %2548 = vadd.xlane.f32.xlu1 (!%p2923_p8), %v2529_v53  ;;  %v2543_v55 = vld [vmem:[%s4412_s8] sm:$0x3] (!%p2923_p8) }
0x10a0   : > { %2542 = sbr.rel (%p2923_p8) target bundleno = 4575 (0x11df), region = 84  ;;  %v2591_v57 = vrot.slane (!%p2923_p8), %v2543_v55, %v4074_v28  ;;  %v2599_v51 = vrot.slane (!%p2923_p8), %v2543_v55, %v4077_v29 }
0x10a3   : > { %2546 = vadd.xlane.f32.xlu0 (!%p2923_p8), %v2528_v15  ;;  %2550 = vadd.xlane.f32.xlu1 (!%p2923_p8), %v2530_v26 }
0x112c   : > { %v2545_v63 = vpop.xlane.xlu0 %2544  ;;  %v2549_v49 = vpop.xlane.xlu1 %2548 }
0x112d   : > { %v2552_v5 = vmul.f32 0.0078125, %v2545_v63  ;;  %v2554_v30 = vmul.f32 0.0078125, %v2549_v49 }
0x112f   : > { %v2556_v48 = vsub.f32 %v2527_v25, %v2552_v5  ;;  %v2558_v31 = vsub.f32 %v2529_v53, %v2554_v30 }
0x1130   : > { %v2547_v32 = vpop.xlane.xlu0 %2546  ;;  %v2551_v12 = vpop.xlane.xlu1 %2550 }
0x1131   : > { %v2553_v33 = vmul.f32 0.0078125, %v2547_v32  ;;  %v2560_v19 = vmul.f32 %v2556_v48, %v2556_v48  ;;  %v2555_v34 = vmul.f32 0.0078125, %v2551_v12  ;;  %v2562_v37 = vmul.f32 %v2558_v31, %v2558_v31 }
0x1133   : > { %v2557_v35 = vsub.f32 %v2528_v15, %v2553_v33  ;;  %2564 = vadd.xlane.f32.xlu0 %v2560_v19  ;;  %v2559_v36 = vsub.f32 %v2530_v26, %v2555_v34 }
0x1135   : > { %v2561_v38 = vmul.f32 %v2557_v35, %v2557_v35  ;;  %v2563_v39 = vmul.f32 %v2559_v36, %v2559_v36 }
0x1137   : > { %2568 = vadd.xlane.f32.xlu0 %v2562_v37  ;;  %2566 = vadd.xlane.f32.xlu1 %v2561_v38 }
0x113b   : > { %2570 = vadd.xlane.f32.xlu1 %v2563_v39 }
0x11c0   : > { %v2565_v40 = vpop.xlane.xlu0 %2564 }
0x11c1   : > { %v2572_v41 = vmul.f32 0.0078125, %v2565_v40 }
0x11c3   : > { %v2576_v27 = vadd.f32 1e-06, %v2572_v41 }
0x11c4   : > { %v2567_v42 = vpop.xlane.xlu1 %2566  ;;  %v2569_v43 = vpop.xlane.xlu0 %2568 }
0x11c5   : > { %3457 = vrsqrt.f32 %v2576_v27  ;;  %v2573_v44 = vmul.f32 0.0078125, %v2567_v42  ;;  %v2574_v45 = vmul.f32 0.0078125, %v2569_v43 }
0x11c7   : > { %v2577_v46 = vadd.f32 1e-06, %v2573_v44  ;;  %v2578_v47 = vadd.f32 1e-06, %v2574_v45 }
0x11c8   : > { %v2571_v52 = vpop.xlane.xlu1 %2570 }
0x11c9   : > { %3459 = vrsqrt.f32 %v2577_v46  ;;  %v2575_v54 = vmul.f32 0.0078125, %v2571_v52 }
0x11ca   : > { %3461 = vrsqrt.f32 %v2578_v47 }
0x11cb   : > { %v2579_v56 = vadd.f32 1e-06, %v2575_v54 }
0x11cd   : > { %3463 = vrsqrt.f32 %v2579_v56 }
0x11cf   : > { %v3458_v59 = vpop.eup %3457 }
0x11d0   : > { %v2584_v60 = vmul.f32 %v3458_v59, %v2556_v48 }
0x11d2   : > { %v2592_v61 = vmul.f32 %v2591_v57, %v2584_v60 }
0x11d3   : > { %v3460_v0 = vpop.eup %3459 }
0x11d4   : > { %v3462_v1 = vpop.eup %3461  ;;  %v2600_v4 = vadd.f32 %v2599_v51, %v2592_v61  ;;  %v2585_v62 = vmul.f32 %v3460_v0, %v2557_v35 }
0x11d5   : > { %v2586_v6 = vmul.f32 %v3462_v1, %v2558_v31 }
0x11d6   : > { %2604 = vst [vmem:[#allocation11] sm:$0xff] %v2600_v4  ;;  %v2593_v50 = vmul.f32 %v2591_v57, %v2585_v62 }
0x11d7   : > { %v3464_v2 = vpop.eup %3463  ;;  %v2594_v7 = vmul.f32 %v2591_v57, %v2586_v6 }
0x11d8   : > { %v2601_v3 = vadd.f32 %v2599_v51, %v2593_v50  ;;  %v2587_v8 = vmul.f32 %v3464_v2, %v2559_v36 }
0x11d9   : > { %v2602_v9 = vadd.f32 %v2599_v51, %v2594_v7 }
0x11da   : > { %2605 = vst [vmem:[#allocation11 + $0x8] sm:$0xff] %v2601_v3  ;;  %v2595_v11 = vmul.f32 %v2591_v57, %v2587_v8 }
0x11db   : > { %2606 = vst [vmem:[#allocation11 + $0x10] sm:$0xff] %v2602_v9 }
0x11dc   : > { %v2603_v28 = vadd.f32 %v2599_v51, %v2595_v11 }
0x11de   : > { %2607 = vst [vmem:[#allocation11 + $0x18] sm:$0xff] %v2603_v28 }
0x11df PF: > { %p3237_p0 = scmp.eq.s32.totalorder %s3771_s15, 1  ;;  %s3689_s3 = smov [#allocation11]  }
0x11e0   : > { %s2618_s18 = sshll.u32 %s3689_s3, 4  ;;  %s2619_s18 = int_to_ptr.vmem [resolvable:$true] %s2618_s18 }
0x11e1   : > { %s3585_s25 = scalar_lea.vmem %s2619_s18, 512  ;;  %p3592_p11 = scmp.lt.s32.totalorder %s2619_s18, %s2619_s18 }
0x11e2   : > { %p3586_p5 = scmp.ne.s32.totalorder %s2619_s18, %s3585_s25  ;;  %p3593_p2 = scmp.lt.s32.totalorder %s3585_s25, %s3585_s25 }
0x11e4   : > { %p3587_p13 = pnand %p3586_p5, %p3237_p0  ;;  %p3594_p10 = por %p3593_p2, %p3592_p11 }
0x11e6   : > { %p3588_p1 = pneg %p3587_p13 }
0x11e8   : > { %p3595_p3 = pnand %p3594_p10, %p3588_p1 }
0x11ea   : > { %3598 = shalt.err (!%p3595_p3)
}
0x11eb   : > { %s4445_s19 = sld [smem:[#allocation23_spill]] }
0x11f1   : > { %s3599_s16 = scalar_lea.hbm %s4445_s19, 512 }
0x11f2   : > { %p3600_p12 = scmp.ne.s32.totalorder %s4445_s19, %s3599_s16  ;;  %p3605_p4 = scmp.lt.u32.totalorder %s3599_s16, %s4445_s19 }
0x11f4   : > { %p3601_p7 = pnand %p3600_p12, %p3237_p0 }
0x11f6   : > { %p3602_p9 = pneg %p3601_p7 }
0x11f8   : > { %p3607_p6 = pnand %p3605_p4, %p3602_p9 }
0x11fa   : > { %3610 = shalt.err (!%p3607_p6)
}
0x11fb   : > { %s3690_s29 = smov 128   ;;  %s3691_s14 = smov 8  }
0x11fc   : > { %3220 = dma.vmem_to_hbm [thread:$0]  (%p3237_p0), %s2619_s18, 512, %s4445_s19, [#allocation5], %s3690_s29, %s3690_s29, %s3691_s14  }
0x11fd   : > { %3648 = dma.done.wait (%p3237_p0), [#allocation5], 512  }
0x11fe   : > { %3650 = vsyncadd (%p3237_p0), [#allocation5], 4294966784 }
0x11ff PF: > { %s4446_s26 = sld [smem:[#allocation17_spill]]  ;;  %s4447_s2 = sld [smem:[#allocation16_spill]] }
0x1200   : > { %s4448_s11 = sld [smem:[#allocation19_spill]]  ;;  %s4449_s17 = sld [smem:[#allocation18_spill]] }
0x1201   : > { %s4450_s30 = smov %s3657_s10  ;;  %s4452_s12 = smov %s3669_s13 }
0x1205   : > { %s29_s14 = sadd.s32 1, %s4446_s26   ;;  %s4451_s10 = smov %s4447_s2 }
0x1206   : > { %p26_p8 = scmp.ge.s32.totalorder %s29_s14, 4   ;;  %s4453_s13 = smov %s4449_s17 }
0x1208   :  { %28 = sbr.rel (!%p26_p8) target bundleno = 14 (0xe), region = 154 }
0x120f   :  { %2634 = vsyncpa [#allocation4], 1 }
0x1210   :  { %2636 = vsyncpa [#allocation4 + $0x1], 1 }
0x1211   :  { %2637 = vsyncpa [#allocation7], 1 }
0x1212   :  { %2639 = vsyncpa [#allocation7 + $0x1], 1 }
0x1213   :  { %2640 = vsyncpa [#allocation10], 1 }
0x1214   :  { %2642 = vsyncpa [#allocation10 + $0x1], 1 }
0x1215   :  { %2643 = vsyncpa [#allocation5], 1 }
0x1216   :  { %2645 = vsyncpa [#allocation5 + $0x1], 1 }

</bundles_post_ra>
